<compile_context>
chip_gen: v5e
topology: v5e:2x2
jax: 0.10.0
libtpu: 0.0.40
codegen_flags: <defaults>
</compile_context>

<pallas_src>
import functools

import jax
import jax.numpy as jnp
from jax import lax
from jax.experimental import pallas as pl
from jax.experimental.pallas import tpu as pltpu


def _dis_block_kernel(xs_ref, w1_ref, b1_ref, w2_ref, b2_ref, o_ref, pad_ref):
    # xs_ref : (1, TH+3, Wb, K1p)   bf16  s2d-packed conv1 input slab (with halo)
    # w1_ref : (4, K1p, C1p)        bf16  conv1 weights (2x2 taps of s2d conv)
    # b1_ref : (1, C1p)             f32
    # w2_ref : (9, C1p, Coutp)      bf16  conv2 weights (3x3 taps)
    # b2_ref : (1, Coutp)           f32
    # o_ref  : (1, TH, Wo, Coutp)   f32
    # pad_ref: VMEM (TH+2, Wo+2, C1p) bf16  padded conv2 input tile
    TH, Wo, Coutp = o_ref.shape[1], o_ref.shape[2], o_ref.shape[3]
    HI = TH + 2                      # intermediate rows incl. top/bottom halo
    K1p, C1p = w1_ref.shape[1], w1_ref.shape[2]

    t = pl.program_id(1)
    n_t = pl.num_programs(1)

    xs = xs_ref[0]                   # (TH+3, Wb, K1p) bf16

    # ---- conv1: 4x4 / stride 2 / pad 1 == 2x2 stride-1 conv on s2d input ----
    # bias-initialized f32 accumulator; bf16 operands feed the MXU.
    acc1 = jnp.broadcast_to(b1_ref[...], (HI * Wo, C1p)).astype(jnp.float32)
    for kyp in range(2):
        for kxp in range(2):
            sl = xs[kyp:kyp + HI, kxp:kxp + Wo, :]            # (HI, Wo, K1p)
            acc1 = acc1 + jnp.dot(sl.reshape(HI * Wo, K1p),
                                  w1_ref[2 * kyp + kxp],
                                  preferred_element_type=jnp.float32)
    y1 = jnp.maximum(acc1, 0.2 * acc1)                        # LeakyReLU(0.2), f32

    # ---- build padded conv2 input tile in VMEM (bf16) ----
    pad_ref[:, 1:Wo + 1, :] = y1.reshape(HI, Wo, C1p).astype(pad_ref.dtype)
    zcol = jnp.zeros((HI, 1, C1p), pad_ref.dtype)
    pad_ref[:, 0:1, :] = zcol                                 # left  zero pad
    pad_ref[:, Wo + 1:Wo + 2, :] = zcol                       # right zero pad

    # halo rows are genuine conv1 outputs for interior tiles; at the global
    # image boundary they must be conv2's zero padding instead.
    zrow = jnp.zeros((1, Wo + 2, C1p), pad_ref.dtype)

    @pl.when(t == 0)
    def _():
        pad_ref[0:1, :, :] = zrow

    @pl.when(t == n_t - 1)
    def _():
        pad_ref[HI - 1:HI, :, :] = zrow

    # ---- conv2: 3x3 / stride 1 / pad 1 ----
    xp = pad_ref[...]                                         # (TH+2, Wo+2, C1p) bf16
    acc2 = jnp.broadcast_to(b2_ref[...], (TH * Wo, Coutp)).astype(jnp.float32)
    for ky in range(3):
        for kx in range(3):
            sl = xp[ky:ky + TH, kx:kx + Wo, :]                # (TH, Wo, C1p)
            acc2 = acc2 + jnp.dot(sl.reshape(TH * Wo, C1p),
                                  w2_ref[3 * ky + kx],
                                  preferred_element_type=jnp.float32)
    y2 = jnp.maximum(acc2, 0.2 * acc2)                        # LeakyReLU(0.2), f32

    o_ref[0] = y2.reshape(TH, Wo, Coutp).astype(o_ref.dtype)


def _vmem_estimate(TH, Wb, Wo, K1p, C1p, Coutp):
    bf2, f4 = 2, 4
    xs_blk = (TH + 3) * Wb * K1p * bf2
    w_blks = 4 * K1p * C1p * bf2 + 9 * C1p * Coutp * bf2 + (C1p + Coutp) * f4
    out_blk = TH * Wo * Coutp * f4
    scratch = (TH + 2) * (Wo + 2) * C1p * bf2
    accs = (TH + 2) * Wo * C1p * f4 + TH * Wo * Coutp * f4
    tap = (TH + 2) * Wo * max(K1p, C1p) * bf2
    # double-buffered pipelined operands + scratch + in-kernel temporaries
    return 2 * (xs_blk + w_blks + out_blk) + scratch + accs + tap


def _pick_tile_rows(Ho, Wb, Wo, K1p, C1p, Coutp, budget=20 << 20):
    """Largest divisor of Ho whose VMEM footprint fits the budget."""
    best = 1
    for th in range(1, Ho + 1):
        if Ho % th == 0 and _vmem_estimate(th, Wb, Wo, K1p, C1p, Coutp) <= budget:
            best = th
    return best


def dis_general_block(x_nchw, w1, b1, w2, b2, *, tile_rows=None):
    """x_nchw: (N, Cin, H, W); weights in PyTorch layout (O, I, kh, kw)."""
    N, Cin, H, W = x_nchw.shape
    C1 = w1.shape[0]                 # == Cin
    Cout = w2.shape[0]
    assert C1 == Cin and w1.shape[1] == Cin and w2.shape[1] == C1
    assert H % 2 == 0 and W % 2 == 0
    Ho, Wo = H // 2, W // 2
    Hb, Wb = Ho + 1, Wo + 1
    K1 = 4 * Cin

    def rup(v, m=128):
        return ((v + m - 1) // m) * m

    K1p, C1p, Coutp = rup(K1), rup(C1), rup(Cout)             # lane-dense channel dims

    TH = tile_rows if tile_rows is not None else _pick_tile_rows(
        Ho, Wb, Wo, K1p, C1p, Coutp)
    assert Ho % TH == 0, "tile_rows must divide H//2"
    nT = Ho // TH
    HI = TH + 2

    # --- preprocessing (fused by XLA under jit) ---
    # NCHW -> NHWC, bf16, zero-pad H/W by 1, space-to-depth(2x2).
    x = jnp.transpose(x_nchw, (0, 2, 3, 1)).astype(jnp.bfloat16)
    xpad = jnp.pad(x, ((0, 0), (1, 1), (1, 1), (0, 0)))
    xs = (xpad.reshape(N, Hb, 2, Wb, 2, Cin)
              .transpose(0, 1, 3, 2, 4, 5)
              .reshape(N, Hb, Wb, K1))
    # 1 extra zero s2d row on top/bottom (global halo) + lane pad of K.
    xs = jnp.pad(xs, ((0, 0), (1, 1), (0, 0), (0, K1p - K1)))
    # gather per-tile slabs (TH+3 rows each, incl. halo) -> non-overlapping blocks
    row_idx = (jnp.arange(nT)[:, None] * TH
               + jnp.arange(TH + 3)[None, :]).reshape(-1)
    xs_tiles = xs[:, row_idx]                                  # (N, nT*(TH+3), Wb, K1p)

    # conv1 weights: (C1, Cin, 4, 4) -> (4 taps, 4*Cin, C1), matching s2d packing.
    w1_t = jnp.transpose(w1, (2, 3, 1, 0))                     # (4, 4, Cin, C1)
    w1s = (w1_t.reshape(2, 2, 2, 2, Cin, C1)
               .transpose(0, 2, 1, 3, 4, 5)
               .reshape(4, K1, C1))
    w1s = jnp.pad(w1s, ((0, 0), (0, K1p - K1), (0, C1p - C1))).astype(jnp.bfloat16)
    # conv2 weights: (Cout, C1, 3, 3) -> (9 taps, C1p, Coutp).
    w2s = jnp.transpose(w2, (2, 3, 1, 0)).reshape(9, C1, Cout)
    w2s = jnp.pad(w2s, ((0, 0), (0, C1p - C1), (0, Coutp - Cout))).astype(jnp.bfloat16)
    b1r = jnp.pad(b1.reshape(1, C1).astype(jnp.float32), ((0, 0), (0, C1p - C1)))
    b2r = jnp.pad(b2.reshape(1, Cout).astype(jnp.float32), ((0, 0), (0, Coutp - Cout)))

    vmem_bytes = _vmem_estimate(TH, Wb, Wo, K1p, C1p, Coutp)
    vmem_limit = int(min(max(2 * vmem_bytes + (4 << 20), 16 << 20), 56 << 20))

    out_nhwc = pl.pallas_call(
        _dis_block_kernel,
        out_shape=jax.ShapeDtypeStruct((N, Ho, Wo, Coutp), jnp.float32),
        grid=(N, nT),
        in_specs=[
            pl.BlockSpec((1, TH + 3, Wb, K1p), lambda n, t: (n, t, 0, 0)),
            pl.BlockSpec((4, K1p, C1p), lambda n, t: (0, 0, 0)),
            pl.BlockSpec((1, C1p), lambda n, t: (0, 0)),
            pl.BlockSpec((9, C1p, Coutp), lambda n, t: (0, 0, 0)),
            pl.BlockSpec((1, Coutp), lambda n, t: (0, 0)),
        ],
        out_specs=pl.BlockSpec((1, TH, Wo, Coutp), lambda n, t: (n, t, 0, 0)),
        scratch_shapes=[pltpu.VMEM((HI, Wo + 2, C1p), jnp.bfloat16)],
        compiler_params=pltpu.CompilerParams(
            dimension_semantics=("parallel", "parallel"),
            vmem_limit_bytes=vmem_limit),
    )(xs_tiles, w1s, b1r, w2s, b2r)

    out = out_nhwc[..., :Cout]                                 # strip lane padding
    return jnp.transpose(out, (0, 3, 1, 2))                    # NHWC -> NCHW


def _reference(x, w1, b1, w2, b2):
    dn = ("NCHW", "OIHW", "NCHW")
    y = lax.conv_general_dilated(x, w1, (2, 2), ((1, 1), (1, 1)),
                                 dimension_numbers=dn)
    y = y + b1[None, :, None, None]
    y = jnp.where(y > 0, y, 0.2 * y)
    y = lax.conv_general_dilated(y, w2, (1, 1), ((1, 1), (1, 1)),
                                 dimension_numbers=dn)
    y = y + b2[None, :, None, None]
    y = jnp.where(y > 0, y, 0.2 * y)
    return y


if __name__ == "__main__":
    key = jax.random.PRNGKey(0)
    N, Cin, Cout, H, W = 2, 4, 8, 16, 16
    k1, k2, k3, k4, k5 = jax.random.split(key, 5)
    x = jax.random.normal(k1, (N, Cin, H, W), jnp.float32)
    w1 = jax.random.normal(k2, (Cin, Cin, 4, 4), jnp.float32) * 0.1
    b1 = jax.random.normal(k3, (Cin,), jnp.float32) * 0.1
    w2 = jax.random.normal(k4, (Cout, Cin, 3, 3), jnp.float32) * 0.1
    b2 = jax.random.normal(k5, (Cout,), jnp.float32) * 0.1

    # tile_rows=4 -> 2 spatial tiles at this small size, exercising the halo path.
    fwd = jax.jit(functools.partial(dis_general_block, tile_rows=4))
    out = jax.block_until_ready(fwd(x, w1, b1, w2, b2))

    ref = jax.block_until_ready(_reference(x, w1, b1, w2, b2))
    assert out.shape == ref.shape == (N, Cout, H // 2, W // 2)
    max_err = float(jnp.max(jnp.abs(out - ref)))
    # bf16 MXU operands with f32 accumulation -> slightly looser tolerance.
    if not bool(jnp.allclose(out, ref, atol=2e-2, rtol=2e-2)):
        raise AssertionError(f"mismatch vs reference, max abs err {max_err:e}")
    print("KERNEL_OK")
</pallas_src>

<mosaic_0001>
module attributes {stable_mosaic.version = 11 : i64} {
  func.func @_dis_block_kernel(%arg0: i32, %arg1: i32, %arg2: memref<1x7x9x128xbf16, #tpu.memory_space<vmem>>, %arg3: memref<4x128x128xbf16, #tpu.memory_space<vmem>>, %arg4: memref<1x128xf32, #tpu.memory_space<vmem>>, %arg5: memref<9x128x128xbf16, #tpu.memory_space<vmem>>, %arg6: memref<1x128xf32, #tpu.memory_space<vmem>>, %arg7: memref<1x4x8x128xf32, #tpu.memory_space<vmem>>, %arg8: memref<6x10x128xbf16, #tpu.memory_space<vmem>>) attributes {dimension_semantics = [#tpu.dimension_semantics<parallel>, #tpu.dimension_semantics<parallel>], iteration_bounds = array<i64: 2, 2>, scalar_prefetch = 0 : i64, scratch_operands = 1 : i64, tpu.core_type = #tpu.core_type<tc>, window_params = [{transform_indices = @transform_0, window_bounds = array<i64: 1, 7, 9, 128>}, {pipeline_mode = #tpu.pipeline_mode<synchronous>, transform_indices = @transform_1, window_bounds = array<i64: 4, 128, 128>}, {pipeline_mode = #tpu.pipeline_mode<synchronous>, transform_indices = @transform_2, window_bounds = array<i64: 1, 128>}, {pipeline_mode = #tpu.pipeline_mode<synchronous>, transform_indices = @transform_3, window_bounds = array<i64: 9, 128, 128>}, {pipeline_mode = #tpu.pipeline_mode<synchronous>, transform_indices = @transform_4, window_bounds = array<i64: 1, 128>}, {transform_indices = @transform_5, window_bounds = array<i64: 1, 4, 8, 128>}]} {
    %c0 = arith.constant 0 : index
    %c0_0 = arith.constant 0 : index
    %c0_1 = arith.constant 0 : index
    %c0_2 = arith.constant 0 : index
    %0 = vector.load %arg2[%c0, %c0_0, %c0_1, %c0_2] : memref<1x7x9x128xbf16, #tpu.memory_space<vmem>>, vector<1x7x9x128xbf16>
    %1 = vector.shape_cast %0 : vector<1x7x9x128xbf16> to vector<7x9x128xbf16>
    %c0_3 = arith.constant 0 : index
    %c0_4 = arith.constant 0 : index
    %2 = vector.load %arg4[%c0_3, %c0_4] : memref<1x128xf32, #tpu.memory_space<vmem>>, vector<1x128xf32>
    %3 = vector.shape_cast %2 : vector<1x128xf32> to vector<1x128xf32>
    %4 = vector.broadcast %3 : vector<1x128xf32> to vector<48x128xf32>
    %5 = vector.extract_strided_slice %1 {offsets = [0, 0, 0], sizes = [6, 8, 128], strides = [1, 1, 1]} : vector<7x9x128xbf16> to vector<6x8x128xbf16>
    %6 = vector.shape_cast %5 : vector<6x8x128xbf16> to vector<48x128xbf16>
    %c0_5 = arith.constant 0 : index
    %c0_6 = arith.constant 0 : index
    %c0_7 = arith.constant 0 : index
    %7 = vector.load %arg3[%c0_5, %c0_6, %c0_7] : memref<4x128x128xbf16, #tpu.memory_space<vmem>>, vector<1x128x128xbf16>
    %8 = vector.shape_cast %7 : vector<1x128x128xbf16> to vector<128x128xbf16>
    %cst = arith.constant dense<0.000000e+00> : vector<48x128xf32>
    %9 = tpu.matmul %6, %8, %cst {dimension_numbers = #tpu.dot_dimension_numbers<[1], [0], [0], [1], [0, 0, 1, 1], [], []>} : vector<48x128xbf16>, vector<128x128xbf16>, vector<48x128xf32> -> vector<48x128xf32>
    %10 = arith.addf %4, %9 : vector<48x128xf32>
    %11 = vector.extract_strided_slice %1 {offsets = [0, 1, 0], sizes = [6, 8, 128], strides = [1, 1, 1]} : vector<7x9x128xbf16> to vector<6x8x128xbf16>
    %12 = vector.shape_cast %11 : vector<6x8x128xbf16> to vector<48x128xbf16>
    %c1 = arith.constant 1 : index
    %c0_8 = arith.constant 0 : index
    %c0_9 = arith.constant 0 : index
    %13 = vector.load %arg3[%c1, %c0_8, %c0_9] : memref<4x128x128xbf16, #tpu.memory_space<vmem>>, vector<1x128x128xbf16>
    %14 = vector.shape_cast %13 : vector<1x128x128xbf16> to vector<128x128xbf16>
    %cst_10 = arith.constant dense<0.000000e+00> : vector<48x128xf32>
    %15 = tpu.matmul %12, %14, %cst_10 {dimension_numbers = #tpu.dot_dimension_numbers<[1], [0], [0], [1], [0, 0, 1, 1], [], []>} : vector<48x128xbf16>, vector<128x128xbf16>, vector<48x128xf32> -> vector<48x128xf32>
    %16 = arith.addf %10, %15 : vector<48x128xf32>
    %17 = vector.extract_strided_slice %1 {offsets = [1, 0, 0], sizes = [6, 8, 128], strides = [1, 1, 1]} : vector<7x9x128xbf16> to vector<6x8x128xbf16>
    %18 = vector.shape_cast %17 : vector<6x8x128xbf16> to vector<48x128xbf16>
    %c2 = arith.constant 2 : index
    %c0_11 = arith.constant 0 : index
    %c0_12 = arith.constant 0 : index
    %19 = vector.load %arg3[%c2, %c0_11, %c0_12] : memref<4x128x128xbf16, #tpu.memory_space<vmem>>, vector<1x128x128xbf16>
    %20 = vector.shape_cast %19 : vector<1x128x128xbf16> to vector<128x128xbf16>
    %cst_13 = arith.constant dense<0.000000e+00> : vector<48x128xf32>
    %21 = tpu.matmul %18, %20, %cst_13 {dimension_numbers = #tpu.dot_dimension_numbers<[1], [0], [0], [1], [0, 0, 1, 1], [], []>} : vector<48x128xbf16>, vector<128x128xbf16>, vector<48x128xf32> -> vector<48x128xf32>
    %22 = arith.addf %16, %21 : vector<48x128xf32>
    %23 = vector.extract_strided_slice %1 {offsets = [1, 1, 0], sizes = [6, 8, 128], strides = [1, 1, 1]} : vector<7x9x128xbf16> to vector<6x8x128xbf16>
    %24 = vector.shape_cast %23 : vector<6x8x128xbf16> to vector<48x128xbf16>
    %c3 = arith.constant 3 : index
    %c0_14 = arith.constant 0 : index
    %c0_15 = arith.constant 0 : index
    %25 = vector.load %arg3[%c3, %c0_14, %c0_15] : memref<4x128x128xbf16, #tpu.memory_space<vmem>>, vector<1x128x128xbf16>
    %26 = vector.shape_cast %25 : vector<1x128x128xbf16> to vector<128x128xbf16>
    %cst_16 = arith.constant dense<0.000000e+00> : vector<48x128xf32>
    %27 = tpu.matmul %24, %26, %cst_16 {dimension_numbers = #tpu.dot_dimension_numbers<[1], [0], [0], [1], [0, 0, 1, 1], [], []>} : vector<48x128xbf16>, vector<128x128xbf16>, vector<48x128xf32> -> vector<48x128xf32>
    %28 = arith.addf %22, %27 : vector<48x128xf32>
    %cst_17 = arith.constant 2.000000e-01 : f32
    %29 = vector.broadcast %cst_17 : f32 to vector<48x128xf32>
    %30 = arith.mulf %29, %28 : vector<48x128xf32>
    %31 = arith.maximumf %28, %30 : vector<48x128xf32>
    %32 = vector.shape_cast %31 : vector<48x128xf32> to vector<6x8x128xf32>
    %33 = arith.truncf %32 : vector<6x8x128xf32> to vector<6x8x128xbf16>
    %c0_18 = arith.constant 0 : index
    %c1_19 = arith.constant 1 : index
    %c0_20 = arith.constant 0 : index
    %34 = vector.load %arg8[%c0_18, %c1_19, %c0_20] : memref<6x10x128xbf16, #tpu.memory_space<vmem>>, vector<6x8x128xbf16>
    tpu.vector_store %arg8[%c0_18, %c1_19, %c0_20], %33 {strides = array<i32>} : memref<6x10x128xbf16, #tpu.memory_space<vmem>>, vector<6x8x128xbf16>,
    %cst_21 = arith.constant 0.000000e+00 : bf16
    %35 = vector.broadcast %cst_21 : bf16 to vector<6x1x128xbf16>
    %c0_22 = arith.constant 0 : index
    %c0_23 = arith.constant 0 : index
    %c0_24 = arith.constant 0 : index
    %36 = vector.load %arg8[%c0_22, %c0_23, %c0_24] : memref<6x10x128xbf16, #tpu.memory_space<vmem>>, vector<6x1x128xbf16>
    tpu.vector_store %arg8[%c0_22, %c0_23, %c0_24], %35 {strides = array<i32>} : memref<6x10x128xbf16, #tpu.memory_space<vmem>>, vector<6x1x128xbf16>,
    %c0_25 = arith.constant 0 : index
    %c9 = arith.constant 9 : index
    %c0_26 = arith.constant 0 : index
    %37 = vector.load %arg8[%c0_25, %c9, %c0_26] : memref<6x10x128xbf16, #tpu.memory_space<vmem>>, vector<6x1x128xbf16>
    tpu.vector_store %arg8[%c0_25, %c9, %c0_26], %35 {strides = array<i32>} : memref<6x10x128xbf16, #tpu.memory_space<vmem>>, vector<6x1x128xbf16>,
    %cst_27 = arith.constant 0.000000e+00 : bf16
    %38 = vector.broadcast %cst_27 : bf16 to vector<1x10x128xbf16>
    %c0_i32 = arith.constant 0 : i32
    %39 = arith.cmpi eq, %arg1, %c0_i32 : i32
    %40 = arith.extui %39 : i1 to i32
    %c0_i32_28 = arith.constant 0 : i32
    %41 = arith.cmpi ne, %40, %c0_i32_28 : i32
    scf.if %41 {
      %c0_71 = arith.constant 0 : index
      %c0_72 = arith.constant 0 : index
      %c0_73 = arith.constant 0 : index
      %110 = vector.load %arg8[%c0_71, %c0_72, %c0_73] : memref<6x10x128xbf16, #tpu.memory_space<vmem>>, vector<1x10x128xbf16>
      tpu.vector_store %arg8[%c0_71, %c0_72, %c0_73], %38 {strides = array<i32>} : memref<6x10x128xbf16, #tpu.memory_space<vmem>>, vector<1x10x128xbf16>,
    } else {
    }
    %c1_i32 = arith.constant 1 : i32
    %42 = arith.cmpi eq, %arg1, %c1_i32 : i32
    %43 = arith.extui %42 : i1 to i32
    %c0_i32_29 = arith.constant 0 : i32
    %44 = arith.cmpi ne, %43, %c0_i32_29 : i32
    scf.if %44 {
      %c5_71 = arith.constant 5 : index
      %c0_72 = arith.constant 0 : index
      %c0_73 = arith.constant 0 : index
      %110 = vector.load %arg8[%c5_71, %c0_72, %c0_73] : memref<6x10x128xbf16, #tpu.memory_space<vmem>>, vector<1x10x128xbf16>
      tpu.vector_store %arg8[%c5_71, %c0_72, %c0_73], %38 {strides = array<i32>} : memref<6x10x128xbf16, #tpu.memory_space<vmem>>, vector<1x10x128xbf16>,
    } else {
    }
    %c0_30 = arith.constant 0 : index
    %c0_31 = arith.constant 0 : index
    %c0_32 = arith.constant 0 : index
    %45 = vector.load %arg8[%c0_30, %c0_31, %c0_32] : memref<6x10x128xbf16, #tpu.memory_space<vmem>>, vector<6x10x128xbf16>
    %c0_33 = arith.constant 0 : index
    %c0_34 = arith.constant 0 : index
    %46 = vector.load %arg6[%c0_33, %c0_34] : memref<1x128xf32, #tpu.memory_space<vmem>>, vector<1x128xf32>
    %47 = vector.shape_cast %46 : vector<1x128xf32> to vector<1x128xf32>
    %48 = vector.broadcast %47 : vector<1x128xf32> to vector<32x128xf32>
    %49 = vector.extract_strided_slice %45 {offsets = [0, 0, 0], sizes = [4, 8, 128], strides = [1, 1, 1]} : vector<6x10x128xbf16> to vector<4x8x128xbf16>
    %50 = vector.shape_cast %49 : vector<4x8x128xbf16> to vector<32x128xbf16>
    %c0_35 = arith.constant 0 : index
    %c0_36 = arith.constant 0 : index
    %c0_37 = arith.constant 0 : index
    %51 = vector.load %arg5[%c0_35, %c0_36, %c0_37] : memref<9x128x128xbf16, #tpu.memory_space<vmem>>, vector<1x128x128xbf16>
    %52 = vector.shape_cast %51 : vector<1x128x128xbf16> to vector<128x128xbf16>
    %cst_38 = arith.constant dense<0.000000e+00> : vector<32x128xf32>
    %53 = tpu.matmul %50, %52, %cst_38 {dimension_numbers = #tpu.dot_dimension_numbers<[1], [0], [0], [1], [0, 0, 1, 1], [], []>} : vector<32x128xbf16>, vector<128x128xbf16>, vector<32x128xf32> -> vector<32x128xf32>
    %54 = arith.addf %48, %53 : vector<32x128xf32>
    %55 = vector.extract_strided_slice %45 {offsets = [0, 1, 0], sizes = [4, 8, 128], strides = [1, 1, 1]} : vector<6x10x128xbf16> to vector<4x8x128xbf16>
    %56 = vector.shape_cast %55 : vector<4x8x128xbf16> to vector<32x128xbf16>
    %c1_39 = arith.constant 1 : index
    %c0_40 = arith.constant 0 : index
    %c0_41 = arith.constant 0 : index
    %57 = vector.load %arg5[%c1_39, %c0_40, %c0_41] : memref<9x128x128xbf16, #tpu.memory_space<vmem>>, vector<1x128x128xbf16>
    %58 = vector.shape_cast %57 : vector<1x128x128xbf16> to vector<128x128xbf16>
    %cst_42 = arith.constant dense<0.000000e+00> : vector<32x128xf32>
    %59 = tpu.matmul %56, %58, %cst_42 {dimension_numbers = #tpu.dot_dimension_numbers<[1], [0], [0], [1], [0, 0, 1, 1], [], []>} : vector<32x128xbf16>, vector<128x128xbf16>, vector<32x128xf32> -> vector<32x128xf32>
    %60 = arith.addf %54, %59 : vector<32x128xf32>
    %61 = vector.extract_strided_slice %45 {offsets = [0, 2, 0], sizes = [4, 8, 128], strides = [1, 1, 1]} : vector<6x10x128xbf16> to vector<4x8x128xbf16>
    %62 = vector.shape_cast %61 : vector<4x8x128xbf16> to vector<32x128xbf16>
    %c2_43 = arith.constant 2 : index
    %c0_44 = arith.constant 0 : index
    %c0_45 = arith.constant 0 : index
    %63 = vector.load %arg5[%c2_43, %c0_44, %c0_45] : memref<9x128x128xbf16, #tpu.memory_space<vmem>>, vector<1x128x128xbf16>
    %64 = vector.shape_cast %63 : vector<1x128x128xbf16> to vector<128x128xbf16>
    %cst_46 = arith.constant dense<0.000000e+00> : vector<32x128xf32>
    %65 = tpu.matmul %62, %64, %cst_46 {dimension_numbers = #tpu.dot_dimension_numbers<[1], [0], [0], [1], [0, 0, 1, 1], [], []>} : vector<32x128xbf16>, vector<128x128xbf16>, vector<32x128xf32> -> vector<32x128xf32>
    %66 = arith.addf %60, %65 : vector<32x128xf32>
    %67 = vector.extract_strided_slice %45 {offsets = [1, 0, 0], sizes = [4, 8, 128], strides = [1, 1, 1]} : vector<6x10x128xbf16> to vector<4x8x128xbf16>
    %68 = vector.shape_cast %67 : vector<4x8x128xbf16> to vector<32x128xbf16>
    %c3_47 = arith.constant 3 : index
    %c0_48 = arith.constant 0 : index
    %c0_49 = arith.constant 0 : index
    %69 = vector.load %arg5[%c3_47, %c0_48, %c0_49] : memref<9x128x128xbf16, #tpu.memory_space<vmem>>, vector<1x128x128xbf16>
    %70 = vector.shape_cast %69 : vector<1x128x128xbf16> to vector<128x128xbf16>
    %cst_50 = arith.constant dense<0.000000e+00> : vector<32x128xf32>
    %71 = tpu.matmul %68, %70, %cst_50 {dimension_numbers = #tpu.dot_dimension_numbers<[1], [0], [0], [1], [0, 0, 1, 1], [], []>} : vector<32x128xbf16>, vector<128x128xbf16>, vector<32x128xf32> -> vector<32x128xf32>
    %72 = arith.addf %66, %71 : vector<32x128xf32>
    %73 = vector.extract_strided_slice %45 {offsets = [1, 1, 0], sizes = [4, 8, 128], strides = [1, 1, 1]} : vector<6x10x128xbf16> to vector<4x8x128xbf16>
    %74 = vector.shape_cast %73 : vector<4x8x128xbf16> to vector<32x128xbf16>
    %c4 = arith.constant 4 : index
    %c0_51 = arith.constant 0 : index
    %c0_52 = arith.constant 0 : index
    %75 = vector.load %arg5[%c4, %c0_51, %c0_52] : memref<9x128x128xbf16, #tpu.memory_space<vmem>>, vector<1x128x128xbf16>
    %76 = vector.shape_cast %75 : vector<1x128x128xbf16> to vector<128x128xbf16>
    %cst_53 = arith.constant dense<0.000000e+00> : vector<32x128xf32>
    %77 = tpu.matmul %74, %76, %cst_53 {dimension_numbers = #tpu.dot_dimension_numbers<[1], [0], [0], [1], [0, 0, 1, 1], [], []>} : vector<32x128xbf16>, vector<128x128xbf16>, vector<32x128xf32> -> vector<32x128xf32>
    %78 = arith.addf %72, %77 : vector<32x128xf32>
    %79 = vector.extract_strided_slice %45 {offsets = [1, 2, 0], sizes = [4, 8, 128], strides = [1, 1, 1]} : vector<6x10x128xbf16> to vector<4x8x128xbf16>
    %80 = vector.shape_cast %79 : vector<4x8x128xbf16> to vector<32x128xbf16>
    %c5 = arith.constant 5 : index
    %c0_54 = arith.constant 0 : index
    %c0_55 = arith.constant 0 : index
    %81 = vector.load %arg5[%c5, %c0_54, %c0_55] : memref<9x128x128xbf16, #tpu.memory_space<vmem>>, vector<1x128x128xbf16>
    %82 = vector.shape_cast %81 : vector<1x128x128xbf16> to vector<128x128xbf16>
    %cst_56 = arith.constant dense<0.000000e+00> : vector<32x128xf32>
    %83 = tpu.matmul %80, %82, %cst_56 {dimension_numbers = #tpu.dot_dimension_numbers<[1], [0], [0], [1], [0, 0, 1, 1], [], []>} : vector<32x128xbf16>, vector<128x128xbf16>, vector<32x128xf32> -> vector<32x128xf32>
    %84 = arith.addf %78, %83 : vector<32x128xf32>
    %85 = vector.extract_strided_slice %45 {offsets = [2, 0, 0], sizes = [4, 8, 128], strides = [1, 1, 1]} : vector<6x10x128xbf16> to vector<4x8x128xbf16>
    %86 = vector.shape_cast %85 : vector<4x8x128xbf16> to vector<32x128xbf16>
    %c6 = arith.constant 6 : index
    %c0_57 = arith.constant 0 : index
    %c0_58 = arith.constant 0 : index
    %87 = vector.load %arg5[%c6, %c0_57, %c0_58] : memref<9x128x128xbf16, #tpu.memory_space<vmem>>, vector<1x128x128xbf16>
    %88 = vector.shape_cast %87 : vector<1x128x128xbf16> to vector<128x128xbf16>
    %cst_59 = arith.constant dense<0.000000e+00> : vector<32x128xf32>
    %89 = tpu.matmul %86, %88, %cst_59 {dimension_numbers = #tpu.dot_dimension_numbers<[1], [0], [0], [1], [0, 0, 1, 1], [], []>} : vector<32x128xbf16>, vector<128x128xbf16>, vector<32x128xf32> -> vector<32x128xf32>
    %90 = arith.addf %84, %89 : vector<32x128xf32>
    %91 = vector.extract_strided_slice %45 {offsets = [2, 1, 0], sizes = [4, 8, 128], strides = [1, 1, 1]} : vector<6x10x128xbf16> to vector<4x8x128xbf16>
    %92 = vector.shape_cast %91 : vector<4x8x128xbf16> to vector<32x128xbf16>
    %c7 = arith.constant 7 : index
    %c0_60 = arith.constant 0 : index
    %c0_61 = arith.constant 0 : index
    %93 = vector.load %arg5[%c7, %c0_60, %c0_61] : memref<9x128x128xbf16, #tpu.memory_space<vmem>>, vector<1x128x128xbf16>
    %94 = vector.shape_cast %93 : vector<1x128x128xbf16> to vector<128x128xbf16>
    %cst_62 = arith.constant dense<0.000000e+00> : vector<32x128xf32>
    %95 = tpu.matmul %92, %94, %cst_62 {dimension_numbers = #tpu.dot_dimension_numbers<[1], [0], [0], [1], [0, 0, 1, 1], [], []>} : vector<32x128xbf16>, vector<128x128xbf16>, vector<32x128xf32> -> vector<32x128xf32>
    %96 = arith.addf %90, %95 : vector<32x128xf32>
    %97 = vector.extract_strided_slice %45 {offsets = [2, 2, 0], sizes = [4, 8, 128], strides = [1, 1, 1]} : vector<6x10x128xbf16> to vector<4x8x128xbf16>
    %98 = vector.shape_cast %97 : vector<4x8x128xbf16> to vector<32x128xbf16>
    %c8 = arith.constant 8 : index
    %c0_63 = arith.constant 0 : index
    %c0_64 = arith.constant 0 : index
    %99 = vector.load %arg5[%c8, %c0_63, %c0_64] : memref<9x128x128xbf16, #tpu.memory_space<vmem>>, vector<1x128x128xbf16>
    %100 = vector.shape_cast %99 : vector<1x128x128xbf16> to vector<128x128xbf16>
    %cst_65 = arith.constant dense<0.000000e+00> : vector<32x128xf32>
    %101 = tpu.matmul %98, %100, %cst_65 {dimension_numbers = #tpu.dot_dimension_numbers<[1], [0], [0], [1], [0, 0, 1, 1], [], []>} : vector<32x128xbf16>, vector<128x128xbf16>, vector<32x128xf32> -> vector<32x128xf32>
    %102 = arith.addf %96, %101 : vector<32x128xf32>
    %cst_66 = arith.constant 2.000000e-01 : f32
    %103 = vector.broadcast %cst_66 : f32 to vector<32x128xf32>
    %104 = arith.mulf %103, %102 : vector<32x128xf32>
    %105 = arith.maximumf %102, %104 : vector<32x128xf32>
    %106 = vector.shape_cast %105 : vector<32x128xf32> to vector<4x8x128xf32>
    %c0_67 = arith.constant 0 : index
    %c0_68 = arith.constant 0 : index
    %c0_69 = arith.constant 0 : index
    %c0_70 = arith.constant 0 : index
    %107 = vector.load %arg7[%c0_67, %c0_68, %c0_69, %c0_70] : memref<1x4x8x128xf32, #tpu.memory_space<vmem>>, vector<1x4x8x128xf32>
    %108 = vector.shape_cast %107 : vector<1x4x8x128xf32> to vector<4x8x128xf32>
    %109 = vector.shape_cast %106 : vector<4x8x128xf32> to vector<1x4x8x128xf32>
    tpu.vector_store %arg7[%c0_67, %c0_68, %c0_69, %c0_70], %109 {strides = array<i32>} : memref<1x4x8x128xf32, #tpu.memory_space<vmem>>, vector<1x4x8x128xf32>,
    return
  }
  func.func @transform_0(%arg0: i32, %arg1: i32) -> (i32, i32, i32, i32) {
    %c0_i32 = arith.constant 0 : i32
    %c0_i32_0 = arith.constant 0 : i32
    %c0_i32_1 = arith.constant 0 : i32
    return %arg0, %arg1, %c0_i32, %c0_i32_0 : i32, i32, i32, i32
  }
  func.func @transform_1(%arg0: i32, %arg1: i32) -> (i32, i32, i32) {
    %c0_i32 = arith.constant 0 : i32
    %c0_i32_0 = arith.constant 0 : i32
    %c0_i32_1 = arith.constant 0 : i32
    %c0_i32_2 = arith.constant 0 : i32
    return %c0_i32, %c0_i32_0, %c0_i32_1 : i32, i32, i32
  }
  func.func @transform_2(%arg0: i32, %arg1: i32) -> (i32, i32) {
    %c0_i32 = arith.constant 0 : i32
    %c0_i32_0 = arith.constant 0 : i32
    %c0_i32_1 = arith.constant 0 : i32
    return %c0_i32, %c0_i32_0 : i32, i32
  }
  func.func @transform_3(%arg0: i32, %arg1: i32) -> (i32, i32, i32) {
    %c0_i32 = arith.constant 0 : i32
    %c0_i32_0 = arith.constant 0 : i32
    %c0_i32_1 = arith.constant 0 : i32
    %c0_i32_2 = arith.constant 0 : i32
    return %c0_i32, %c0_i32_0, %c0_i32_1 : i32, i32, i32
  }
  func.func @transform_4(%arg0: i32, %arg1: i32) -> (i32, i32) {
    %c0_i32 = arith.constant 0 : i32
    %c0_i32_0 = arith.constant 0 : i32
    %c0_i32_1 = arith.constant 0 : i32
    return %c0_i32, %c0_i32_0 : i32, i32
  }
  func.func @transform_5(%arg0: i32, %arg1: i32) -> (i32, i32, i32, i32) {
    %c0_i32 = arith.constant 0 : i32
    %c0_i32_0 = arith.constant 0 : i32
    %c0_i32_1 = arith.constant 0 : i32
    return %arg0, %arg1, %c0_i32, %c0_i32_0 : i32, i32, i32, i32
  }
}

</mosaic_0001>

<bundles_post_ra>
// kernel: dis_general_block.1
= control target key start
LH: loop header
LB: loop body
LE: loop exit
PB: predicated region body
PF: predicated region fallthrough
CT: control target
= control target key end

     0   :  { %s2905_s18 = smov 0   ;;  %s2907_s19 = smov 0   ;;  %s3524_s0 = inlined_call_operand.vmem [shape: bf16[2,14,9,128], index: 0, kind: input, shape index: {}]   ;;  %s3525_s1 = inlined_call_operand.vmem [shape: bf16[4,128,128], index: 1, kind: input, shape index: {}]   ;;  %s3526_s2 = inlined_call_operand.vmem [shape: f32[1,128], index: 2, kind: input, shape index: {}]   ;;  %s3527_s3 = inlined_call_operand.vmem [shape: bf16[9,128,128], index: 3, kind: input, shape index: {}]   ;;  %s3528_s4 = inlined_call_operand.vmem [shape: f32[1,128], index: 4, kind: input, shape index: {}]   ;;  %s3529_s5 = inlined_call_operand.vmem [shape: f32[2,8,8,128], index: 5, kind: output, shape index: {}]  }
   0x1   :  { %s2909_s20 = smov 0   ;;  %s2911_s21 = smov 0  }
   0x2   :  { %s2913_s22 = smov 0  }
   0x3 LB: > { %s24_s23 = sadd.s32 1, %s2863_s20  ;;  %s27_s24 = sadd.s32 1, %s2867_s21  ;;  %s2871_s22 = sphi %s2913_s22, %s15_s22   ;;  %s2867_s21 = sphi %s2911_s21, %s3543_s21   ;;  %s2863_s20 = sphi %s2909_s20, %s3542_s20   ;;  %s2859_s19 = sphi %s2907_s19, %s3541_s19   ;;  %s2855_s18 = sphi %s2905_s18, %s3540_s18  }
   0x4   : > { %p25_p0 = scmp.ge.s32.totalorder %s24_s23, 2  ;;  %p2068_p1 = scmp.ge.s32.totalorder %s2871_s22, 1 }
   0x5   : > { %p209_p2 = scmp.lt.s32.totalorder %s2871_s22, 5 }
   0x6   : > { %s3545_s23 = smov (%p25_p0, %s24_s23), 0  ;;  %s3547_s24 = smov (!%p25_p0, %s27_s24), %s2867_s21 }
   0x7   : > { %p210_p3 = pnand %p2068_p1, %p209_p2  ;;  %p29_p4 = scmp.ge.s32.totalorder %s3547_s24, 2 }
   0x8   : > { %s246_s6 = smul.u32 (!%p210_p3), 7, %s2855_s18  ;;  %p247_p5 = scmp.lt.s32.totalorder (!%p210_p3), %s2859_s19, 1 }
   0x9   : > { %s3549_s24 = smov (%p29_p4, %s3547_s24), 0  ;;  %213 = sbr.rel (%p210_p3) target bundleno = 500 (0x1f4), region = 40 }
   0xa   : > { %s2071_s9 = sshll.u32 (!%p210_p3), %s2855_s18, 2  ;;  %p249_p6 = scmp.lt.s32.totalorder (!%p210_p3), %s246_s6, 13 }
   0xb   : > { %p260_p7 = scmp.lt.s32.totalorder (!%p210_p3), %s2071_s9, 7  ;;  %p2250_p8 = scmp.ne.s32.totalorder (!%p210_p3), %s2855_s18, 0 }
   0xe   : > { %v2683_v0 = vld [vmem:[%s3525_s1 + $0x38] sm:$0xff]  ;;  %v2682_v4 = vld [vmem:[%s3525_s1 + $0x30] sm:$0xff]  ;;  %s3551_s19 = smov (!%p247_p5, %s2859_s19), 1  ;;  %s3553_s6 = smov (!%p249_p6, %s246_s6), 13  ;;  %v2681_v8 = vld [vmem:[%s3525_s1 + $0x28] sm:$0xff]  ;;  %vm889_vm3 = vcmask 1043456  }
   0xf   : > { %v2691_v1 = vld [vmem:[%s3525_s1 + $0x78] sm:$0xff]  ;;  %368 = vmatpush.bf16.msra.mxu0 %v2683_v0  ;;  %v2690_v5 = vld [vmem:[%s3525_s1 + $0x70] sm:$0xff]  ;;  %s2788_s25 = smul.u32 28, %s3551_s19  ;;  %s2072_s26 = sshll.u32 %s3551_s19, 3  ;;  %v2689_v9 = vld [vmem:[%s3525_s1 + $0x68] sm:$0xff]  ;;  %vm895_vm5 = vcmask 1040384  }
  0x10   : > { %v2699_v2 = vld [vmem:[%s3525_s1 + $0xb8] sm:$0xff]  ;;  %562 = vmatpush.bf16.msra.mxu1 %v2691_v1  ;;  %v2698_v6 = vld [vmem:[%s3525_s1 + $0xb0] sm:$0xff]  ;;  %s3555_s9 = smov (!%p260_p7, %s2071_s9), 7  ;;  %v2697_v10 = vld [vmem:[%s3525_s1 + $0xa8] sm:$0xff]  ;;  %s2069_s11 = sshll.u32 %s3553_s6, 1 }
  0x11   : > { %v2707_v3 = vld [vmem:[%s3525_s1 + $0xf8] sm:$0xff]  ;;  %665 = vmatpush.bf16.msra.mxu2 %v2699_v2  ;;  %v2706_v7 = vld [vmem:[%s3525_s1 + $0xf0] sm:$0xff]  ;;  %v2705_v11 = vld [vmem:[%s3525_s1 + $0xe8] sm:$0xff]  ;;  %s253_s12 = sadd.s32 %s2788_s25, %s2069_s11  ;;  %s263_s13 = sadd.s32 %s2072_s26, %s3555_s9  ;;  %vm398_vm0 = vsmask.f32 3328 }
  0x12   : > { %781 = vmatpush.bf16.msra.mxu3 %v2707_v3  ;;  %v2680_v12 = vld [vmem:[%s3525_s1 + $0x20] sm:$0xff]  ;;  %s2070_s16 = sshll.u32 %s253_s12, 2  ;;  %s2073_s17 = sshll.u32 %s263_s13, 3  ;;  %v2679_v22 = vld [vmem:[%s3525_s1 + $0x18] sm:$0xff]  ;;  %vm399_vm1 = vsmask.f32 7440 }
  0x13   : > { %369 = vmatpush.bf16.msra.mxu0 %v2682_v4  ;;  %v2688_v13 = vld [vmem:[%s3525_s1 + $0x60] sm:$0xff]  ;;  %s2990_s26 = scalar_lea.vmem %s3524_s0, %s2070_s16  ;;  %s2995_s19 = scalar_lea.vmem %s3529_s5, %s2073_s17  ;;  %v2687_v27 = vld [vmem:[%s3525_s1 + $0x58] sm:$0xff]  ;;  %v2678_v39 = vld [vmem:[%s3525_s1 + $0x10] sm:$0xff]  ;;  %vm890_vm4 = vsmask.f32 7938 }
  0x14   : > { %563 = vmatpush.bf16.msra.mxu1 %v2690_v5  ;;  %v2696_v14 = vld [vmem:[%s3525_s1 + $0xa0] sm:$0xff]  ;;  %v3001_v17 = vld [vmem:[%s2990_s26 + $0x8] sm:$0xf]  ;;  %v271_v21 = vld [vmem:[%s2990_s26 + $0xc] sm:$0x1] }
  0x15   : > { %666 = vmatpush.bf16.msra.mxu2 %v2698_v6  ;;  %v2704_v15 = vld [vmem:[%s3525_s1 + $0xe0] sm:$0xff]  ;;  %v416_v23 = vshrl.u32 %v3001_v17, 16  ;;  %v419_v24 = vshll.u32 %v3001_v17, 16  ;;  %v3013_v26 = vld [vmem:[%s2990_s26 + $0x10] sm:$0xf]  ;;  %v425_v30 = vshll.u32 %v271_v21, 16  ;;  %vm3044_vm2 = vmor %vm398_vm0, %vm399_vm1  ;;  %v309_v5 = vunpack.c.l.b16 %v3001_v17 }
  0x16   : > { %782 = vmatpush.bf16.msra.mxu3 %v2706_v7  ;;  %v2998_v16 = vld [vmem:[%s2990_s26] sm:$0xf]  ;;  %v269_v18 = vld [vmem:[%s2990_s26 + $0x4] sm:$0x1]  ;;  %v273_v31 = vld [vmem:[%s2990_s26 + $0x14] sm:$0x1] }
  0x17   : > { %370 = vmatpush.bf16.msra.mxu0 %v2681_v8  ;;  %v402_v19 = vshrl.u32 %v2998_v16, 16  ;;  %v405_v20 = vshll.u32 %v2998_v16, 16  ;;  %v411_v25 = vshll.u32 %v269_v18, 16  ;;  %v2695_v32 = vld [vmem:[%s3525_s1 + $0x98] sm:$0xff]  ;;  %v418_v34 = vrot.slane %v416_v23, 4  ;;  %v2686_v40 = vld [vmem:[%s3525_s1 + $0x50] sm:$0xff]  ;;  %vm3113_vm7 = vmand %vm889_vm3, %vm890_vm4 }
  0x18   : > { %564 = vmatpush.bf16.msra.mxu1 %v2689_v9  ;;  %v2703_v33 = vld [vmem:[%s3525_s1 + $0xd8] sm:$0xff]  ;;  %v421_v35 = vrot.slane %v419_v24, 5  ;;  %v430_v37 = vshrl.u32 %v3013_v26, 16  ;;  %v433_v38 = vshll.u32 %v3013_v26, 16  ;;  %v439_v43 = vshll.u32 %v273_v31, 16  ;;  %v2694_v49 = vld [vmem:[%s3525_s1 + $0x90] sm:$0xff]  ;;  %vm3129_vm9 = vmand %vm895_vm5, %vm890_vm4 }
  0x19   : > { %667 = vmatpush.bf16.msra.mxu2 %v2697_v10  ;;  %v404_v28 = vrot.slane %v402_v19, 4  ;;  %v407_v29 = vrot.slane %v405_v20, 5  ;;  %v413_v41 = vrot.slane %v411_v25, 5  ;;  %v427_v45 = vrot.slane %v425_v30, 5  ;;  %v3034_v48 = vld [vmem:[%s2990_s26 + $0x18] sm:$0xf] }
  0x1a   : > { %783 = vmatpush.bf16.msra.mxu3 %v2705_v11  ;;  %v422_v42 = vor.u32 %v421_v35, %v418_v34  ;;  %v432_v46 = vrot.slane %v430_v37, 4  ;;  %v435_v47 = vrot.slane %v433_v38, 5  ;;  %v2702_v50 = vld [vmem:[%s3525_s1 + $0xd0] sm:$0xff]  ;;  %v441_v54 = vrot.slane %v439_v43, 5  ;;  %v3049_v55 = vld [vmem:[%s2990_s26 + $0x20] sm:$0xf] }
  0x1b   : > { %371 = vmatpush.bf16.msra.mxu0 %v2680_v12  ;;  %v408_v36 = vor.u32 %v407_v29, %v404_v28  ;;  %v444_v56 = vshrl.u32 %v3034_v48, 16  ;;  %v2677_v57 = vld [vmem:[%s3525_s1 + $0x8] sm:$0xff]  ;;  %v447_v62 = vshll.u32 %v3034_v48, 16  ;;  %v458_v1 = vshrl.u32 %v3049_v55, 16  ;;  %v2676_v8 = vld [vmem:[%s3525_s1] sm:$0xff] }
  0x1c   : > { %565 = vmatpush.bf16.msra.mxu1 %v2688_v13  ;;  %v423_v52 = vrot.slane %v422_v42, 4  ;;  %v436_v53 = vor.u32 %v435_v47, %v432_v46  ;;  %v2685_v58 = vld [vmem:[%s3525_s1 + $0x48] sm:$0xff]  ;;  %v461_v2 = vshll.u32 %v3049_v55, 16  ;;  %v308_v4 = vunpack.c.l.b16 %v2998_v16  ;;  %v2684_v9 = vld [vmem:[%s3525_s1 + $0x40] sm:$0xff]  ;;  %v275_v16 = vld [vmem:[%s2990_s26 + $0x1c] sm:$0x1] }
  0x1d   : > { %668 = vmatpush.bf16.msra.mxu2 %v2696_v14  ;;  %v409_v44 = vrot.slane %v408_v36, 4  ;;  %v2693_v63 = vld [vmem:[%s3525_s1 + $0x88] sm:$0xff]  ;;  %v310_v10 = vunpack.c.l.b16 %v3013_v26  ;;  %v446_v12 = vrot.slane %v444_v56, 4  ;;  %v449_v13 = vrot.slane %v447_v62, 5  ;;  %v2692_v14 = vld [vmem:[%s3525_s1 + $0x80] sm:$0xff] }
  0x1e   : > { %784 = vmatpush.bf16.msra.mxu3 %v2704_v15  ;;  %v428_v60 = vsel %vm3044_vm2, %v423_v52, %v427_v45  ;;  %v437_v61 = vrot.slane %v436_v53, 4  ;;  %v2701_v0 = vld [vmem:[%s3525_s1 + $0xc8] sm:$0xff]  ;;  %v2700_v15 = vld [vmem:[%s3525_s1 + $0xc0] sm:$0xff]  ;;  %v460_v17 = vrot.slane %v458_v1, 4  ;;  %v463_v18 = vrot.slane %v461_v2, 5 }
  0x1f   : > { %372 = vmatpush.bf16.msra.mxu0 %v2679_v22  ;;  %v414_v59 = vsel %vm3044_vm2, %v409_v44, %v413_v41  ;;  %v503_v7 = vunpack.c.l.b16 %v428_v60  ;;  %v277_v19 = vld [vmem:[%s2990_s26 + $0x24] sm:$0x1]  ;;  %v314_v20 = vpack.c.b16 %v309_v5, %v308_v4  ;;  %v611_v22 = vpack.c.b16 %v310_v10, %v309_v5  ;;  %v279_v46 = vld [vmem:[%s2990_s26 + $0x2c] sm:$0x1] }
  0x20   : > { %566 = vmatpush.bf16.msra.mxu1 %v2687_v27  ;;  %v442_v3 = vsel %vm3044_vm2, %v437_v61, %v441_v54  ;;  %v502_v6 = vunpack.c.l.b16 %v414_v59  ;;  %v450_v24 = vor.u32 %v449_v13, %v446_v12  ;;  %v453_v25 = vshll.u32 %v275_v16, 16 }
  0x21   : > { %669 = vmatpush.bf16.msra.mxu2 %v2695_v32  ;;  %v504_v11 = vunpack.c.l.b16 %v442_v3  ;;  %v464_v26 = vor.u32 %v463_v18, %v460_v17  ;;  %v467_v27 = vshll.u32 %v277_v19, 16  ;;  %v278_v32 = vld [vmem:[%s2990_s26 + $0x28] sm:$0xf]  ;;  %v312_v42 = vunpack.c.l.b16 %v3049_v55 }
  0x22   : > { %785 = vmatpush.bf16.msra.mxu3 %v2703_v33  ;;  %v508_v21 = vpack.c.b16 %v503_v7, %v502_v6  ;;  %v451_v28 = vrot.slane %v450_v24, 4  ;;  %v455_v29 = vrot.slane %v453_v25, 5  ;;  %v280_v33 = vld [vmem:[%s2990_s26 + $0x30] sm:$0xf]  ;;  %v472_v35 = vshrl.u32 %v278_v32, 16 }
  0x23   : > { %373 = vmatpush.bf16.msra.mxu0 %v2678_v39  ;;  %v727_v23 = vpack.c.b16 %v504_v11, %v503_v7  ;;  %v465_v30 = vrot.slane %v464_v26, 4  ;;  %v469_v31 = vrot.slane %v467_v27, 5  ;;  %v475_v36 = vshll.u32 %v278_v32, 16 }
  0x24   : > { %567 = vmatpush.bf16.msra.mxu1 %v2686_v40  ;;  %v456_v34 = vsel %vm3044_vm2, %v451_v28, %v455_v29  ;;  %v696_v38 = vshrl.u32 %v280_v33, 16  ;;  %v699_v39 = vshll.u32 %v280_v33, 16  ;;  %v311_v40 = vunpack.c.l.b16 %v3034_v48 }
  0x25   : > { %670 = vmatpush.bf16.msra.mxu2 %v2694_v49  ;;  %v470_v37 = vsel %vm3044_vm2, %v465_v30, %v469_v31  ;;  %v505_v41 = vunpack.c.l.b16 %v456_v34  ;;  %v474_v44 = vrot.slane %v472_v35, 4  ;;  %v477_v45 = vrot.slane %v475_v36, 5 }
  0x26   : > { %786 = vmatpush.bf16.msra.mxu3 %v2702_v50  ;;  %v506_v43 = vunpack.c.l.b16 %v470_v37  ;;  %v698_v47 = vrot.slane %v696_v38, 4  ;;  %v701_v49 = vrot.slane %v699_v39, 5  ;;  %v281_v50 = vld [vmem:[%s2990_s26 + $0x34] sm:$0x1]  ;;  %v315_v52 = vpack.c.b16 %v311_v40, %v310_v10  ;;  %v892_v38 = vld [vmem:[#allocation2] sm:$0xf] }
  0x27   : > { %374 = vmatpush.bf16.msra.mxu0 %v2677_v57  ;;  %v509_v53 = vpack.c.b16 %v505_v41, %v504_v11  ;;  %v612_v54 = vpack.c.b16 %v312_v42, %v311_v40  ;;  %v478_v57 = vor.u32 %v477_v45, %v474_v44  ;;  %v705_v60 = vshll.u32 %v281_v50, 16  ;;  %v898_v40 = vld [vmem:[#allocation2 + $0x4] sm:$0x1] }
  0x28   : > { %568 = vmatpush.bf16.msra.mxu1 %v2685_v58  ;;  %v728_v56 = vpack.c.b16 %v506_v43, %v505_v41  ;;  %v481_v58 = vshll.u32 %v279_v46, 16  ;;  %v702_v59 = vor.u32 %v701_v49, %v698_v47  ;;  %v313_v1 = vunpack.c.l.b16 %v278_v32 }
  0x29   : > { %671 = vmatpush.bf16.msra.mxu2 %v2693_v63  ;;  %v479_v48 = vrot.slane %v478_v57, 4  ;;  %v707_v62 = vrot.slane %v705_v60, 5  ;;  %v610_v3 = vunpack.c.l.b16 %v280_v33  ;;  %vm896_vm6 = vsmask.f32 256 }
  0x2a   : > { %787 = vmatpush.bf16.msra.mxu3 %v2701_v0  ;;  %v483_v55 = vrot.slane %v481_v58, 5  ;;  %v703_v61 = vrot.slane %v702_v59, 4  ;;  %v316_v5 = vpack.c.b16 %v313_v1, %v312_v42  ;;  %vm3118_vm8 = vmand %vm895_vm5, %vm896_vm6 }
  0x2b   : > { %375 = vmatpush.bf16.msra.mxu0 %v2676_v8  ;;  %v613_v7 = vpack.c.b16 %v610_v3, %v313_v1 }
  0x2c   : > { %569 = vmatpush.bf16.msra.mxu1 %v2684_v9  ;;  %v484_v63 = vsel %vm3044_vm2, %v479_v48, %v483_v55  ;;  %v708_v0 = vsel %vm3044_vm2, %v703_v61, %v707_v62  ;;  %v3107_v9 = vld [vmem:[%s3526_s2] ss:$0 sm:$0xff]  ;;  %v901_v48 = vld [vmem:[#allocation2 + $0x8] sm:$0xf]  ;;  %v904_v62 = vld [vmem:[#allocation2 + $0xc] sm:$0x1] }
  0x2d   : > { %672 = vmatpush.bf16.msra.mxu2 %v2692_v14  ;;  %v507_v2 = vunpack.c.l.b16 %v484_v63  ;;  %v726_v4 = vunpack.c.l.b16 %v708_v0 }
  0x2e   : > { %788 = vmatpush.bf16.msra.mxu3 %v2700_v15  ;;  %376 = vmatmul.bf16.vlgmr.msra.gmra.mxu0 %v314_v20 }
  0x2f   : > { %570 = vmatmul.bf16.vlgmr.msra.gmra.mxu1 %v508_v21  ;;  %v510_v6 = vpack.c.b16 %v507_v2, %v506_v43  ;;  %v729_v8 = vpack.c.b16 %v726_v4, %v507_v2 }
  0x30   : > { %673 = vmatmul.bf16.vlgmr.msra.gmra.mxu2 %v611_v22 }
  0x31   : > { %789 = vmatmul.bf16.vlgmr.msra.gmra.mxu3 %v727_v23 }
  0x3e   : > { %381 = vmatmul.bf16.gmra.mxu0 %v315_v52 }
  0x3f   : > { %575 = vmatmul.bf16.gmra.mxu1 %v509_v53 }
  0x40   : > { %678 = vmatmul.bf16.gmra.mxu2 %v612_v54 }
  0x41   : > { %794 = vmatmul.bf16.gmra.mxu3 %v728_v56 }
  0x4e   : > { %386 = vmatmul.bf16.gmra.mxu0 %v316_v5 }
  0x4f   : > { %580 = vmatmul.bf16.gmra.mxu1 %v510_v6 }
  0x50   : > { %683 = vmatmul.bf16.gmra.mxu2 %v613_v7 }
  0x51   : > { %799 = vmatmul.bf16.gmra.mxu3 %v729_v8 }
  0xab   : > { %v377_v10 = vpop.f32.mrf.mxu0 }
  0xac   : > { %v571_v11 = vpop.f32.mrf.mxu1  ;;  %v392_v12 = vadd.f32 %v3107_v9, %v377_v10 }
  0xae   : > { %v586_v13 = vadd.f32 %v571_v11, %v392_v12 }
  0xb3   : > { %v674_v14 = vpop.f32.mrf.mxu2  ;;  %v379_v17 = vpop.f32.mrf.mxu0 }
  0xb4   : > { %v790_v15 = vpop.f32.mrf.mxu3  ;;  %v689_v16 = vadd.f32 %v674_v14, %v586_v13  ;;  %v573_v18 = vpop.f32.mrf.mxu1  ;;  %v393_v20 = vadd.f32 %v3107_v9, %v379_v17 }
  0xb6   : > { %v805_v19 = vadd.f32 %v790_v15, %v689_v16  ;;  %v587_v23 = vadd.f32 %v573_v18, %v393_v20 }
  0xb8   : > { %v811_v21 = vmul.f32 0.2, %v805_v19 }
  0xba   : > { %v817_v22 = vmax.f32 %v805_v19, %v811_v21 }
  0xbb   : > { %v676_v24 = vpop.f32.mrf.mxu2  ;;  %v382_v28 = vpop.f32.mrf.mxu0 }
  0xbc   : > { %v792_v25 = vpop.f32.mrf.mxu3  ;;  %v823_v26 = vpack.c.bf16 %v817_v22, %v817_v22  ;;  %v690_v27 = vadd.f32 %v676_v24, %v587_v23  ;;  %v576_v29 = vpop.f32.mrf.mxu1  ;;  %v394_v30 = vadd.f32 %v3107_v9, %v382_v28  ;;  %v907_v22 = vld [vmem:[#allocation2 + $0x10] sm:$0xf]  ;;  %v910_v23 = vld [vmem:[#allocation2 + $0x14] sm:$0x1] }
  0xbe   : > { %v830_v31 = vshrl.u32 %v823_v26, 16  ;;  %v806_v32 = vadd.f32 %v792_v25, %v690_v27  ;;  %v833_v34 = vshll.u32 %v823_v26, 16  ;;  %v588_v37 = vadd.f32 %v576_v29, %v394_v30 }
  0xc0   : > { %v832_v33 = vrot.slane %v830_v31, 7  ;;  %v812_v36 = vmul.f32 0.2, %v806_v32 }
  0xc2   : > { %v835_v41 = vor.u32 %v833_v34, %v832_v33  ;;  %v836_v42 = vrot.slane %v832_v33, 4  ;;  %v818_v43 = vmax.f32 %v806_v32, %v812_v36 }
  0xc3   : > { %v679_v44 = vpop.f32.mrf.mxu2  ;;  %v384_v52 = vpop.f32.mrf.mxu0 }
  0xc4   : > { %v795_v45 = vpop.f32.mrf.mxu3  ;;  %v893_v46 = vsel %vm3113_vm7, %v835_v41, %v892_v38  ;;  %v899_v47 = vsel %vm3118_vm8, %v836_v42, %v898_v40  ;;  %v824_v49 = vpack.c.bf16 %v818_v43, %v818_v43  ;;  %v691_v50 = vadd.f32 %v679_v44, %v588_v37  ;;  %v578_v53 = vpop.f32.mrf.mxu1 }
  0xc5   : > { %894 = vst [vmem:[#allocation2] sm:$0xf] %v893_v46  ;;  %v395_v57 = vadd.f32 %v3107_v9, %v384_v52  ;;  %v913_v46 = vld [vmem:[#allocation2 + $0x18] sm:$0xf] }
  0xc6   : > { %900 = vst [vmem:[#allocation2 + $0x4] sm:$0x1] %v899_v47  ;;  %v838_v54 = vshrl.u32 %v824_v49, 16  ;;  %v807_v56 = vadd.f32 %v795_v45, %v691_v50  ;;  %v841_v59 = vshll.u32 %v824_v49, 16  ;;  %v916_v47 = vld [vmem:[#allocation2 + $0x1c] sm:$0x1] }
  0xc7   : > { %v589_v0 = vadd.f32 %v578_v53, %v395_v57 }
  0xc8   : > { %v840_v58 = vrot.slane %v838_v54, 7  ;;  %v813_v60 = vmul.f32 0.2, %v807_v56 }
  0xca   : > { %v843_v55 = vor.u32 %v841_v59, %v840_v58  ;;  %v844_v61 = vrot.slane %v840_v58, 4  ;;  %v819_v63 = vmax.f32 %v807_v56, %v813_v60 }
  0xcb   : > { %v681_v2 = vpop.f32.mrf.mxu2  ;;  %v387_v8 = vpop.f32.mrf.mxu0 }
  0xcc   : > { %v797_v3 = vpop.f32.mrf.mxu3  ;;  %v931_v4 = vld [vmem:[#allocation2] sm:$0x1]  ;;  %v902_v5 = vsel %vm3113_vm7, %v843_v55, %v901_v48  ;;  %v825_v6 = vpack.c.bf16 %v819_v63, %v819_v63  ;;  %v692_v7 = vadd.f32 %v681_v2, %v589_v0  ;;  %v905_v12 = vsel %vm3118_vm8, %v844_v61, %v904_v62  ;;  %v581_v17 = vpop.f32.mrf.mxu1 }
  0xcd   : > { %v932_v10 = vsel %vm3118_vm8, 0, %v931_v4  ;;  %v950_v11 = vld [vmem:[#allocation2 + $0x4] sm:$0x1]  ;;  %903 = vst [vmem:[#allocation2 + $0x8] sm:$0xf] %v902_v5  ;;  %v396_v13 = vadd.f32 %v3107_v9, %v387_v8 }
  0xce   : > { %933 = vst [vmem:[#allocation2] sm:$0x1] %v932_v10  ;;  %v951_v14 = vsel %vm3129_vm9, 0, %v950_v11  ;;  %v846_v15 = vshrl.u32 %v825_v6, 16  ;;  %v808_v16 = vadd.f32 %v797_v3, %v692_v7  ;;  %v849_v19 = vshll.u32 %v825_v6, 16 }
  0xcf   : > { %952 = vst [vmem:[#allocation2 + $0x4] sm:$0x1] %v951_v14  ;;  %v590_v21 = vadd.f32 %v581_v17, %v396_v13  ;;  %v919_v5 = vld [vmem:[#allocation2 + $0x20] sm:$0xf]  ;;  %v922_v6 = vld [vmem:[#allocation2 + $0x24] sm:$0x1] }
  0xd0   : > { %906 = vst [vmem:[#allocation2 + $0xc] sm:$0x1] %v905_v12  ;;  %v848_v18 = vrot.slane %v846_v15, 7  ;;  %v814_v20 = vmul.f32 0.2, %v808_v16 }
  0xd2   : > { %v851_v24 = vor.u32 %v849_v19, %v848_v18  ;;  %v852_v25 = vrot.slane %v848_v18, 4  ;;  %v820_v26 = vmax.f32 %v808_v16, %v814_v20 }
  0xd3   : > { %v684_v27 = vpop.f32.mrf.mxu2  ;;  %v389_v34 = vpop.f32.mrf.mxu0 }
  0xd4   : > { %v800_v28 = vpop.f32.mrf.mxu3  ;;  %v934_v29 = vld [vmem:[#allocation2 + $0x8] sm:$0x1]  ;;  %v908_v30 = vsel %vm3113_vm7, %v851_v24, %v907_v22  ;;  %v911_v31 = vsel %vm3118_vm8, %v852_v25, %v910_v23  ;;  %v826_v32 = vpack.c.bf16 %v820_v26, %v820_v26  ;;  %v693_v33 = vadd.f32 %v684_v27, %v590_v21  ;;  %v583_v49 = vpop.f32.mrf.mxu1  ;;  %v928_v22 = vld [vmem:[#allocation2 + $0x2c] sm:$0x1] }
  0xd5   : > { %v935_v36 = vsel %vm3118_vm8, 0, %v934_v29  ;;  %909 = vst [vmem:[#allocation2 + $0x10] sm:$0xf] %v908_v30  ;;  %v397_v40 = vadd.f32 %v3107_v9, %v389_v34  ;;  %v925_v21 = vld [vmem:[#allocation2 + $0x28] sm:$0xf] }
  0xd6   : > { %936 = vst [vmem:[#allocation2 + $0x8] sm:$0x1] %v935_v36  ;;  %v854_v37 = vshrl.u32 %v826_v32, 16  ;;  %v809_v38 = vadd.f32 %v800_v28, %v693_v33  ;;  %v857_v44 = vshll.u32 %v826_v32, 16 }
  0xd7   : > { %v953_v41 = vld [vmem:[#allocation2 + $0xc] sm:$0x1]  ;;  %912 = vst [vmem:[#allocation2 + $0x14] sm:$0x1] %v911_v31  ;;  %v591_v54 = vadd.f32 %v583_v49, %v397_v40 }
  0xd8   : > { %v954_v42 = vsel %vm3129_vm9, 0, %v953_v41  ;;  %v856_v43 = vrot.slane %v854_v37, 7  ;;  %v815_v45 = vmul.f32 0.2, %v809_v38 }
  0xd9   : > { %955 = vst [vmem:[#allocation2 + $0xc] sm:$0x1] %v954_v42 }
  0xda   : > { %v859_v50 = vor.u32 %v857_v44, %v856_v43  ;;  %v860_v52 = vrot.slane %v856_v43, 4  ;;  %v821_v53 = vmax.f32 %v809_v38, %v815_v45 }
  0xdb   : > { %v686_v56 = vpop.f32.mrf.mxu2 }
  0xdc   : > { %v937_v57 = vld [vmem:[#allocation2 + $0x10] sm:$0x1]  ;;  %v914_v9 = vsel %vm3113_vm7, %v859_v50, %v913_v46  ;;  %v917_v58 = vsel %vm3118_vm8, %v860_v52, %v916_v47  ;;  %v827_v59 = vpack.c.bf16 %v821_v53, %v821_v53  ;;  %v694_v60 = vadd.f32 %v686_v56, %v591_v54  ;;  %v802_v55 = vpop.f32.mrf.mxu3 }
  0xdd   : > { %v938_v48 = vsel %vm3118_vm8, 0, %v937_v57  ;;  %915 = vst [vmem:[#allocation2 + $0x18] sm:$0xf] %v914_v9 }
  0xde   : > { %939 = vst [vmem:[#allocation2 + $0x10] sm:$0x1] %v938_v48  ;;  %v956_v61 = vld [vmem:[#allocation2 + $0x14] sm:$0x1]  ;;  %v862_v62 = vshrl.u32 %v827_v59, 16  ;;  %v810_v63 = vadd.f32 %v802_v55, %v694_v60  ;;  %v865_v3 = vshll.u32 %v827_v59, 16 }
  0xdf   : > { %v957_v0 = vsel %vm3129_vm9, 0, %v956_v61  ;;  %918 = vst [vmem:[#allocation2 + $0x1c] sm:$0x1] %v917_v58 }
  0xe0   : > { %958 = vst [vmem:[#allocation2 + $0x14] sm:$0x1] %v957_v0  ;;  %v864_v2 = vrot.slane %v862_v62, 7  ;;  %v816_v4 = vmul.f32 0.2, %v810_v63 }
  0xe2   : > { %v867_v7 = vor.u32 %v865_v3, %v864_v2  ;;  %v868_v8 = vrot.slane %v864_v2, 4  ;;  %v822_v10 = vmax.f32 %v810_v63, %v816_v4 }
  0xe4   : > { %v940_v11 = vld [vmem:[#allocation2 + $0x18] sm:$0x1]  ;;  %v920_v12 = vsel %vm3113_vm7, %v867_v7, %v919_v5  ;;  %v923_v13 = vsel %vm3118_vm8, %v868_v8, %v922_v6  ;;  %v828_v14 = vpack.c.bf16 %v822_v10, %v822_v10 }
  0xe5   : > { %v941_v15 = vsel %vm3118_vm8, 0, %v940_v11  ;;  %921 = vst [vmem:[#allocation2 + $0x20] sm:$0xf] %v920_v12 }
  0xe6   : > { %942 = vst [vmem:[#allocation2 + $0x18] sm:$0x1] %v941_v15  ;;  %v959_v16 = vld [vmem:[#allocation2 + $0x1c] sm:$0x1]  ;;  %v870_v17 = vshrl.u32 %v828_v14, 16  ;;  %v873_v20 = vshll.u32 %v828_v14, 16 }
  0xe7   : > { %v960_v18 = vsel %vm3129_vm9, 0, %v959_v16  ;;  %924 = vst [vmem:[#allocation2 + $0x24] sm:$0x1] %v923_v13 }
  0xe8   : > { %961 = vst [vmem:[#allocation2 + $0x1c] sm:$0x1] %v960_v18  ;;  %v872_v19 = vrot.slane %v870_v17, 7 }
  0xea   : > { %v875_v23 = vor.u32 %v873_v20, %v872_v19  ;;  %v876_v24 = vrot.slane %v872_v19, 4 }
  0xec   : > { %v943_v25 = vld [vmem:[#allocation2 + $0x20] sm:$0x1]  ;;  %v926_v26 = vsel %vm3113_vm7, %v875_v23, %v925_v21  ;;  %v929_v27 = vsel %vm3118_vm8, %v876_v24, %v928_v22 }
  0xed   : > { %v944_v28 = vsel %vm3118_vm8, 0, %v943_v25  ;;  %927 = vst [vmem:[#allocation2 + $0x28] sm:$0xf] %v926_v26 }
  0xee   : > { %945 = vst [vmem:[#allocation2 + $0x20] sm:$0x1] %v944_v28  ;;  %v962_v29 = vld [vmem:[#allocation2 + $0x24] sm:$0x1] }
  0xef   : > { %v963_v30 = vsel %vm3129_vm9, 0, %v962_v29  ;;  %930 = vst [vmem:[#allocation2 + $0x2c] sm:$0x1] %v929_v27 }
  0xf0   : > { %964 = vst [vmem:[#allocation2 + $0x24] sm:$0x1] %v963_v30 }
  0xf4   : > { %v946_v31 = vld [vmem:[#allocation2 + $0x28] sm:$0x1]  ;;  %971 = sbr.rel (%p2250_p8) target bundleno = 252 (0xfc), region = 44 }
  0xf5   : > { %v947_v32 = vsel %vm3118_vm8, 0, %v946_v31 }
  0xf6   : > { %948 = vst [vmem:[#allocation2 + $0x28] sm:$0x1] %v947_v32  ;;  %v965_v35 = vld [vmem:[#allocation2 + $0x2c] sm:$0x1] }
  0xf7   : > { %v966_v33 = vsel %vm3129_vm9, 0, %v965_v35 }
  0xf8   : > { %967 = vst [vmem:[#allocation2 + $0x2c] sm:$0x1] %v966_v33 }
  0xf9   : > { %v2873_v34 = vmov 0  }
  0xfa   : > { %972 = vst [vmem:[#allocation2] sm:$0xf] %v2873_v34 }
  0xfb   : > { %973 = vst [vmem:[#allocation2 + $0x4] sm:$0x1] %v2873_v34 }
  0xfc PF: > { %p2251_p9 = scmp.ne.s32.totalorder %s2855_s18, 1 }
  0xfe   : > { %977 = sbr.rel (%p2251_p9) target bundleno = 262 (0x106), region = 48 }
 0x103   : > { %v2874_v36 = vmov 0  }
 0x104   : > { %979 = vst [vmem:[#allocation2 + $0x28] sm:$0xf] %v2874_v36 }
 0x105   : > { %980 = vst [vmem:[#allocation2 + $0x2c] sm:$0x1] %v2874_v36 }
 0x106 PF: > { %v2715_v39 = vld [vmem:[%s3527_s3 + $0x38] sm:$0xff]  ;;  %v2714_v40 = vld [vmem:[%s3527_s3 + $0x30] sm:$0xff]  ;;  %v2713_v44 = vld [vmem:[%s3527_s3 + $0x28] sm:$0xff]  ;;  %vm1252_vm10 = vcmask 1042432   ;;  %vm1253_vm11 = vcmask 1046532  }
 0x107   : > { %v2723_v1 = vld [vmem:[%s3527_s3 + $0x78] sm:$0xff]  ;;  %1073 = vmatpush.bf16.msrb.mxu0 %v2715_v39  ;;  %v2722_v41 = vld [vmem:[%s3527_s3 + $0x70] sm:$0xff]  ;;  %v2721_v45 = vld [vmem:[%s3527_s3 + $0x68] sm:$0xff] }
 0x108   : > { %v2731_v37 = vld [vmem:[%s3527_s3 + $0xb8] sm:$0xff]  ;;  %1225 = vmatpush.bf16.msrb.mxu1 %v2723_v1  ;;  %v2730_v42 = vld [vmem:[%s3527_s3 + $0xb0] sm:$0xff]  ;;  %v2729_v46 = vld [vmem:[%s3527_s3 + $0xa8] sm:$0xff] }
 0x109   : > { %v2739_v38 = vld [vmem:[%s3527_s3 + $0xf8] sm:$0xff]  ;;  %1344 = vmatpush.bf16.msrb.mxu2 %v2731_v37  ;;  %v2738_v43 = vld [vmem:[%s3527_s3 + $0xf0] sm:$0xff]  ;;  %v2737_v47 = vld [vmem:[%s3527_s3 + $0xe8] sm:$0xff] }
 0x10a   : > { %1438 = vmatpush.bf16.msrb.mxu3 %v2739_v38  ;;  %v2712_v49 = vld [vmem:[%s3527_s3 + $0x20] sm:$0xff]  ;;  %v3231_v56 = vld [vmem:[#allocation2 + $0x8] sm:$0xf]  ;;  %v984_v9 = vld [vmem:[#allocation2 + $0xc] sm:$0x1] }
 0x10b   : > { %1074 = vmatpush.bf16.msrb.mxu0 %v2714_v40  ;;  %v2720_v50 = vld [vmem:[%s3527_s3 + $0x60] sm:$0xff]  ;;  %v1111_v48 = vshrl.u32 %v3231_v56, 16  ;;  %v1114_v55 = vshll.u32 %v3231_v56, 16  ;;  %v2711_v61 = vld [vmem:[%s3527_s3 + $0x18] sm:$0xff]  ;;  %v1120_v2 = vshll.u32 %v984_v9, 16  ;;  %v2710_v13 = vld [vmem:[%s3527_s3 + $0x10] sm:$0xff]  ;;  %v1018_v1 = vunpack.c.l.b16 %v3231_v56 }
 0x10c   : > { %1226 = vmatpush.bf16.msrb.mxu1 %v2722_v41  ;;  %v2728_v52 = vld [vmem:[%s3527_s3 + $0xa0] sm:$0xff]  ;;  %v2719_v62 = vld [vmem:[%s3527_s3 + $0x58] sm:$0xff]  ;;  %v2718_v14 = vld [vmem:[%s3527_s3 + $0x50] sm:$0xff]  ;;  %v2333_v18 = vrot.slane %v3231_v56, 9  ;;  %v1261_v19 = vrot.slane %v984_v9, 5 }
 0x10d   : > { %1345 = vmatpush.bf16.msrb.mxu2 %v2730_v42  ;;  %v2736_v53 = vld [vmem:[%s3527_s3 + $0xe0] sm:$0xff]  ;;  %v2727_v3 = vld [vmem:[%s3527_s3 + $0x98] sm:$0xff]  ;;  %v1113_v5 = vrot.slane %v1111_v48, 4  ;;  %v1116_v6 = vrot.slane %v1114_v55, 5  ;;  %v1122_v16 = vrot.slane %v1120_v2, 5  ;;  %vm3256_vm12 = vmor %vm1252_vm10, %vm1253_vm11 }
 0x10e   : > { %1439 = vmatpush.bf16.msrb.mxu3 %v2738_v43  ;;  %v3229_v54 = vld [vmem:[#allocation2] sm:$0xf]  ;;  %v982_v57 = vld [vmem:[#allocation2 + $0x4] sm:$0x1]  ;;  %v2735_v4 = vld [vmem:[%s3527_s3 + $0xd8] sm:$0xff]  ;;  %v3287_v32 = vsel %vm3256_vm12, %v2333_v18, %v1261_v19 }
 0x10f   : > { %1075 = vmatpush.bf16.msrb.mxu0 %v2713_v44  ;;  %v1097_v58 = vshrl.u32 %v3229_v54, 16  ;;  %v1100_v59 = vshll.u32 %v3229_v54, 16  ;;  %v1106_v60 = vshll.u32 %v982_v57, 16  ;;  %v1117_v10 = vor.u32 %v1116_v6, %v1113_v5  ;;  %v2726_v20 = vld [vmem:[%s3527_s3 + $0x90] sm:$0xff]  ;;  %v3267_v23 = vld [vmem:[#allocation2 + $0x18] sm:$0xf] }
 0x110   : > { %1227 = vmatpush.bf16.msrb.mxu1 %v2721_v45  ;;  %v2332_v11 = vrot.slane %v3229_v54, 9  ;;  %v1257_v12 = vrot.slane %v982_v57, 5  ;;  %v2734_v21 = vld [vmem:[%s3527_s3 + $0xd0] sm:$0xff]  ;;  %v2709_v28 = vld [vmem:[%s3527_s3 + $0x8] sm:$0xff]  ;;  %v1139_v35 = vshrl.u32 %v3267_v23, 16  ;;  %v1142_v36 = vshll.u32 %v3267_v23, 16 }
 0x111   : > { %1346 = vmatpush.bf16.msrb.mxu2 %v2729_v46  ;;  %v1099_v63 = vrot.slane %v1097_v58, 4  ;;  %v1102_v0 = vrot.slane %v1100_v59, 5  ;;  %v1108_v8 = vrot.slane %v1106_v60, 5  ;;  %v1118_v22 = vrot.slane %v1117_v10, 4  ;;  %v3269_v24 = vld [vmem:[#allocation2 + $0x10] sm:$0xf] }
 0x112   : > { %1440 = vmatpush.bf16.msrb.mxu3 %v2737_v47  ;;  %v1258_v25 = vsel %vm3256_vm12, %v2332_v11, %v1257_v12  ;;  %v1125_v26 = vshrl.u32 %v3269_v24, 16  ;;  %v1128_v27 = vshll.u32 %v3269_v24, 16  ;;  %v2717_v29 = vld [vmem:[%s3527_s3 + $0x48] sm:$0xff]  ;;  %v1017_v39 = vunpack.c.l.b16 %v3229_v54  ;;  %v2708_v38 = vld [vmem:[%s3527_s3] sm:$0xff]  ;;  %v986_v45 = vld [vmem:[#allocation2 + $0x14] sm:$0x1] }
 0x113   : > { %1076 = vmatpush.bf16.msrb.mxu0 %v2712_v49  ;;  %v1103_v7 = vor.u32 %v1102_v0, %v1099_v63  ;;  %v1123_v31 = vsel %vm3044_vm2, %v1118_v22, %v1122_v16  ;;  %v2725_v33 = vld [vmem:[%s3527_s3 + $0x88] sm:$0xff]  ;;  %v1019_v37 = vunpack.c.l.b16 %v3269_v24  ;;  %v2716_v40 = vld [vmem:[%s3527_s3 + $0x40] sm:$0xff]  ;;  %v1288_v43 = vunpack.c.l.b16 %v1258_v25  ;;  %v988_v54 = vld [vmem:[#allocation2 + $0x1c] sm:$0x1] }
 0x114   : > { %1228 = vmatpush.bf16.msrb.mxu1 %v2720_v50  ;;  %v2733_v34 = vld [vmem:[%s3527_s3 + $0xc8] sm:$0xff]  ;;  %v3306_v42 = vunpack.c.l.b16 %v1123_v31  ;;  %v1289_v44 = vunpack.c.l.b16 %v3287_v32  ;;  %v1127_v46 = vrot.slane %v1125_v26, 4  ;;  %v1130_v47 = vrot.slane %v1128_v27, 5  ;;  %v2747_v56 = vld [vmem:[%s3527_s3 + $0x138] sm:$0xff]  ;;  %v2746_v2 = vld [vmem:[%s3527_s3 + $0x130] sm:$0xff] }
 0x115   : > { %1347 = vmatpush.bf16.msrb.mxu2 %v2728_v52  ;;  %v1104_v15 = vrot.slane %v1103_v7, 4  ;;  %v1141_v49 = vrot.slane %v1139_v35, 4  ;;  %v1144_v50 = vrot.slane %v1142_v36, 5  ;;  %v2724_v52 = vld [vmem:[%s3527_s3 + $0x80] sm:$0xff]  ;;  %v2755_v57 = vld [vmem:[%s3527_s3 + $0x178] sm:$0xff]  ;;  %v1021_v9 = vpack.c.b16 %v1018_v1, %v1017_v39  ;;  %v2770_v10 = vld [vmem:[%s3527_s3 + $0x1f0] sm:$0xff] }
 0x116   : > { %1441 = vmatpush.bf16.msrb.mxu3 %v2736_v53  ;;  %v2732_v53 = vld [vmem:[%s3527_s3 + $0xc0] sm:$0xff]  ;;  %v1386_v59 = vpack.c.b16 %v1019_v37, %v1018_v1  ;;  %v1134_v60 = vshll.u32 %v986_v45, 16  ;;  %v1292_v48 = vpack.c.b16 %v1289_v44, %v1288_v43  ;;  %v1131_v55 = vor.u32 %v1130_v47, %v1127_v46  ;;  %v2763_v63 = vld [vmem:[%s3527_s3 + $0x1b8] sm:$0xff]  ;;  %v2753_v16 = vld [vmem:[%s3527_s3 + $0x168] sm:$0xff] }
 0x117   : > { %1077 = vmatpush.bf16.msrb.mxu0 %v2711_v61  ;;  %v1109_v30 = vsel %vm3044_vm2, %v1104_v15, %v1108_v8  ;;  %v1145_v61 = vor.u32 %v1144_v50, %v1141_v49  ;;  %v2771_v0 = vld [vmem:[%s3527_s3 + $0x1f8] sm:$0xff]  ;;  %v2762_v8 = vld [vmem:[%s3527_s3 + $0x1b0] sm:$0xff]  ;;  %v2334_v11 = vrot.slane %v3269_v24, 9  ;;  %v1265_v12 = vrot.slane %v986_v45, 5  ;;  %v2745_v15 = vld [vmem:[%s3527_s3 + $0x128] sm:$0xff] }
 0x118   : > { %1229 = vmatpush.bf16.msrb.mxu1 %v2719_v62  ;;  %v1169_v41 = vunpack.c.l.b16 %v1109_v30  ;;  %v1148_v62 = vshll.u32 %v988_v54, 16  ;;  %v1136_v5 = vrot.slane %v1134_v60, 5  ;;  %v3370_v26 = vld [vmem:[#allocation2 + $0x20] sm:$0xf]  ;;  %v2743_v39 = vld [vmem:[%s3527_s3 + $0x118] sm:$0xff]  ;;  %v2750_v46 = vld [vmem:[%s3527_s3 + $0x150] sm:$0xff] }
 0x119   : > { %1348 = vmatpush.bf16.msrb.mxu2 %v2727_v3  ;;  %v2754_v3 = vld [vmem:[%s3527_s3 + $0x170] sm:$0xff]  ;;  %v1146_v6 = vrot.slane %v1145_v61, 4  ;;  %v3364_v22 = vsel %vm3256_vm12, %v2334_v11, %v1265_v12  ;;  %v2744_v27 = vld [vmem:[%s3527_s3 + $0x120] sm:$0xff]  ;;  %v2751_v1 = vld [vmem:[%s3527_s3 + $0x158] sm:$0xff]  ;;  %v2480_v32 = vrot.slane %v3370_v26, 9 }
 0x11a   : > { %1442 = vmatpush.bf16.msrb.mxu3 %v2735_v4  ;;  %v1173_v58 = vpack.c.b16 %v3306_v42, %v1169_v41  ;;  %v1132_v4 = vrot.slane %v1131_v55, 4  ;;  %v1150_v7 = vrot.slane %v1148_v62, 5  ;;  %v1290_v35 = vunpack.c.l.b16 %v3364_v22  ;;  %v2760_v36 = vld [vmem:[%s3527_s3 + $0x1a0] sm:$0xff]  ;;  %v2759_v45 = vld [vmem:[%s3527_s3 + $0x198] sm:$0xff]  ;;  %v2758_v47 = vld [vmem:[%s3527_s3 + $0x190] sm:$0xff] }
 0x11b   : > { %1078 = vmatpush.bf16.msrb.mxu0 %v2710_v13  ;;  %v2335_v13 = vrot.slane %v3267_v23, 9  ;;  %v2767_v24 = vld [vmem:[%s3527_s3 + $0x1d8] sm:$0xff]  ;;  %v2766_v49 = vld [vmem:[%s3527_s3 + $0x1d0] sm:$0xff]  ;;  %v2741_v50 = vld [vmem:[%s3527_s3 + $0x108] sm:$0xff] }
 0x11c   : > { %1230 = vmatpush.bf16.msrb.mxu1 %v2718_v14  ;;  %v1269_v14 = vrot.slane %v988_v54, 5  ;;  %v1137_v18 = vsel %vm3044_vm2, %v1132_v4, %v1136_v5  ;;  %v1151_v19 = vsel %vm3044_vm2, %v1146_v6, %v1150_v7  ;;  %v1462_v54 = vshrl.u32 %v3370_v26, 16  ;;  %v2740_v60 = vld [vmem:[%s3527_s3 + $0x100] sm:$0xff]  ;;  %v2779_v55 = vld [vmem:[%s3527_s3 + $0x238] sm:$0xff]  ;;  %v992_v5 = vld [vmem:[#allocation2 + $0x2c] sm:$0x1] }
 0x11d   : > { %1349 = vmatpush.bf16.msrb.mxu2 %v2726_v20  ;;  %v2761_v20 = vld [vmem:[%s3527_s3 + $0x1a8] sm:$0xff]  ;;  %v3379_v30 = vunpack.c.l.b16 %v1137_v18  ;;  %v3381_v31 = vunpack.c.l.b16 %v1151_v19  ;;  %v1591_v7 = vpack.c.b16 %v1290_v35, %v1289_v44  ;;  %v2778_v11 = vld [vmem:[%s3527_s3 + $0x230] sm:$0xff] }
 0x11e   : > { %1443 = vmatpush.bf16.msrb.mxu3 %v2734_v21  ;;  %v2769_v21 = vld [vmem:[%s3527_s3 + $0x1e8] sm:$0xff]  ;;  %v3368_v25 = vsel %vm3256_vm12, %v2335_v13, %v1269_v14  ;;  %v1464_v61 = vrot.slane %v1462_v54, 4  ;;  %v1768_v13 = vshll.u32 %v992_v5, 16 }
 0x11f   : > { %1079 = vmatpush.bf16.msrb.mxu0 %v2709_v28  ;;  %v2752_v28 = vld [vmem:[%s3527_s3 + $0x160] sm:$0xff]  ;;  %v1493_v6 = vpack.c.b16 %v3379_v30, %v3306_v42 }
 0x120   : > { %1231 = vmatpush.bf16.msrb.mxu1 %v2717_v29  ;;  %v1020_v29 = vunpack.c.l.b16 %v3267_v23  ;;  %v2768_v23 = vld [vmem:[%s3527_s3 + $0x1e0] sm:$0xff]  ;;  %v1770_v18 = vrot.slane %v1768_v13, 5 }
 0x121   : > { %1350 = vmatpush.bf16.msrb.mxu2 %v2725_v33  ;;  %v1291_v33 = vunpack.c.l.b16 %v3368_v25  ;;  %v2773_v25 = vld [vmem:[%s3527_s3 + $0x208] sm:$0xff] }
 0x122   : > { %1444 = vmatpush.bf16.msrb.mxu3 %v2733_v34  ;;  %v1385_v34 = vunpack.c.l.b16 %v3370_v26 }
 0x123   : > { %1080 = vmatpush.bf16.msrb.mxu0 %v2708_v38  ;;  %v1022_v38 = vpack.c.b16 %v1020_v29, %v1019_v37  ;;  %v3404_v41 = vpack.c.b16 %v1291_v33, %v1290_v35  ;;  %v2742_v37 = vld [vmem:[%s3527_s3 + $0x110] sm:$0xff]  ;;  %v2775_v35 = vld [vmem:[%s3527_s3 + $0x218] sm:$0xff] }
 0x124   : > { %1232 = vmatpush.bf16.msrb.mxu1 %v2716_v40  ;;  %v1174_v40 = vpack.c.b16 %v3381_v31, %v3379_v30  ;;  %v1387_v43 = vpack.c.b16 %v1385_v34, %v1020_v29 }
 0x125   : > { %1351 = vmatpush.bf16.msrb.mxu2 %v2724_v52  ;;  %v2749_v52 = vld [vmem:[%s3527_s3 + $0x148] sm:$0xff] }
 0x126   : > { %1445 = vmatpush.bf16.msrb.mxu3 %v2732_v53  ;;  %1081 = vmatmul.bf16.vlgmr.msrb.gmra.mxu0 %v1021_v9  ;;  %v3433_v53 = vld [vmem:[#allocation2 + $0x28] sm:$0xf] }
 0x127   : > { %1545 = vmatpush.bf16.msra.mxu0 %v2747_v56  ;;  %1233 = vmatmul.bf16.vlgmr.msrb.gmra.mxu1 %v1173_v58  ;;  %v1465_v56 = vshll.u32 %v3370_v26, 16  ;;  %v2765_v9 = vld [vmem:[%s3527_s3 + $0x1c8] sm:$0xff]  ;;  %v1759_v58 = vshrl.u32 %v3433_v53, 16  ;;  %v1684_v29 = vunpack.c.l.b16 %v3433_v53 }
 0x128   : > { %1643 = vmatpush.bf16.msra.mxu1 %v2755_v57  ;;  %1352 = vmatmul.bf16.vlgmr.msrb.gmra.mxu2 %v1292_v48  ;;  %v2757_v57 = vld [vmem:[%s3527_s3 + $0x188] sm:$0xff]  ;;  %v2748_v48 = vld [vmem:[%s3527_s3 + $0x140] sm:$0xff] }
 0x129   : > { %1446 = vmatmul.bf16.vlgmr.msrb.gmra.mxu3 %v1386_v59  ;;  %1735 = vmatpush.bf16.msra.mxu2 %v2763_v63  ;;  %v1762_v59 = vshll.u32 %v3433_v53, 16  ;;  %v1467_v62 = vrot.slane %v1465_v56, 5  ;;  %v2756_v63 = vld [vmem:[%s3527_s3 + $0x180] sm:$0xff]  ;;  %v1685_v51 = vpack.c.b16 %v1684_v29, %v1385_v34 }
 0x12a   : > { %1840 = vmatpush.bf16.msra.mxu3 %v2771_v0  ;;  %v2764_v0 = vld [vmem:[%s3527_s3 + $0x1c0] sm:$0xff] }
 0x12b   : > { %1546 = vmatpush.bf16.msra.mxu0 %v2746_v2  ;;  %v990_v2 = vld [vmem:[#allocation2 + $0x24] sm:$0x1]  ;;  %v1764_v4 = vrot.slane %v1762_v59, 5 }
 0x12c   : > { %1644 = vmatpush.bf16.msra.mxu1 %v2754_v3  ;;  %v1761_v3 = vrot.slane %v1759_v58, 4  ;;  %v1571_v44 = vrot.slane %v990_v2, 5 }
 0x12d   : > { %1736 = vmatpush.bf16.msra.mxu2 %v2762_v8  ;;  %v1468_v8 = vor.u32 %v1467_v62, %v1464_v61 }
 0x12e   : > { %1841 = vmatpush.bf16.msra.mxu3 %v2770_v10  ;;  %v1471_v10 = vshll.u32 %v990_v2, 16  ;;  %v1765_v12 = vor.u32 %v1764_v4, %v1761_v3 }
 0x12f   : > { %1547 = vmatpush.bf16.msra.mxu0 %v2745_v15  ;;  %v1469_v42 = vrot.slane %v1468_v8, 4  ;;  %v2777_v15 = vld [vmem:[%s3527_s3 + $0x228] sm:$0xff] }
 0x130   : > { %1645 = vmatpush.bf16.msra.mxu1 %v2753_v16  ;;  %v1473_v14 = vrot.slane %v1471_v10, 5  ;;  %v1766_v16 = vrot.slane %v1765_v12, 4 }
 0x131   : > { %1737 = vmatpush.bf16.msra.mxu2 %v2761_v20  ;;  %v1572_v20 = vsel %vm3256_vm12, %v2480_v32, %v1571_v44 }
 0x132   : > { %1842 = vmatpush.bf16.msra.mxu3 %v2769_v21  ;;  %v1474_v19 = vsel %vm3044_vm2, %v1469_v42, %v1473_v14  ;;  %v2776_v21 = vld [vmem:[%s3527_s3 + $0x220] sm:$0xff]  ;;  %v1771_v22 = vsel %vm3044_vm2, %v1766_v16, %v1770_v18 }
 0x133   : > { %1548 = vmatpush.bf16.msra.mxu0 %v2744_v27  ;;  %v1492_v27 = vunpack.c.l.b16 %v1474_v19  ;;  %v1789_v30 = vunpack.c.l.b16 %v1771_v22 }
 0x134   : > { %1646 = vmatpush.bf16.msra.mxu1 %v2752_v28  ;;  %v1590_v28 = vunpack.c.l.b16 %v1572_v20 }
 0x135   : > { %1738 = vmatpush.bf16.msra.mxu2 %v2760_v36  ;;  %v1494_v36 = vpack.c.b16 %v1492_v27, %v3381_v31  ;;  %v2772_v31 = vld [vmem:[%s3527_s3 + $0x200] sm:$0xff] }
 0x136   : > { %1843 = vmatpush.bf16.msra.mxu3 %v2768_v23  ;;  %1086 = vmatmul.bf16.gmra.mxu0 %v1022_v38  ;;  %v1592_v23 = vpack.c.b16 %v1590_v28, %v1291_v33 }
 0x137   : > { %1549 = vmatpush.bf16.msra.mxu0 %v2743_v39  ;;  %1238 = vmatmul.bf16.gmra.mxu1 %v1174_v40  ;;  %v1790_v39 = vpack.c.b16 %v1789_v30, %v1492_v27 }
 0x138   : > { %1647 = vmatpush.bf16.msra.mxu1 %v2751_v1  ;;  %1357 = vmatmul.bf16.gmra.mxu2 %v3404_v41  ;;  %v2774_v1 = vld [vmem:[%s3527_s3 + $0x210] sm:$0xff] }
 0x139   : > { %1451 = vmatmul.bf16.gmra.mxu3 %v1387_v43  ;;  %1739 = vmatpush.bf16.msra.mxu2 %v2759_v45 }
 0x13a   : > { %1844 = vmatpush.bf16.msra.mxu3 %v2767_v24 }
 0x13b   : > { %1550 = vmatpush.bf16.msra.mxu0 %v2742_v37 }
 0x13c   : > { %1648 = vmatpush.bf16.msra.mxu1 %v2750_v46 }
 0x13d   : > { %1740 = vmatpush.bf16.msra.mxu2 %v2758_v47 }
 0x13e   : > { %1845 = vmatpush.bf16.msra.mxu3 %v2766_v49 }
 0x13f   : > { %1551 = vmatpush.bf16.msra.mxu0 %v2741_v50 }
 0x140   : > { %1649 = vmatpush.bf16.msra.mxu1 %v2749_v52 }
 0x141   : > { %1741 = vmatpush.bf16.msra.mxu2 %v2757_v57 }
 0x142   : > { %1846 = vmatpush.bf16.msra.mxu3 %v2765_v9 }
 0x143   : > { %1552 = vmatpush.bf16.msra.mxu0 %v2740_v60 }
 0x144   : > { %1650 = vmatpush.bf16.msra.mxu1 %v2748_v48 }
 0x145   : > { %1742 = vmatpush.bf16.msra.mxu2 %v2756_v63 }
 0x146   : > { %1847 = vmatpush.bf16.msra.mxu3 %v2764_v0  ;;  %1553 = vmatmul.bf16.vlgmr.msra.gmra.mxu0 %v1493_v6 }
 0x147   : > { %1936 = vmatpush.bf16.msrb.mxu0 %v2779_v55  ;;  %1651 = vmatmul.bf16.vlgmr.msra.gmra.mxu1 %v1591_v7 }
 0x148   : > { %2780 = vmatpush.bf16.msrb.mxu1 %v2779_v55  ;;  %1743 = vmatmul.bf16.vlgmr.msra.gmra.mxu2 %v1022_v38  ;;  %v2625_v38 = vrot.slane %v3433_v53, 9 }
 0x149   : > { %1848 = vmatmul.bf16.vlgmr.msra.gmra.mxu3 %v1174_v40  ;;  %v1866_v40 = vrot.slane %v992_v5, 5 }
 0x14b   : > { %1937 = vmatpush.bf16.msrb.mxu0 %v2778_v11  ;;  %v1867_v26 = vsel %vm3256_vm12, %v2625_v38, %v1866_v40 }
 0x14c   : > { %2781 = vmatpush.bf16.msrb.mxu1 %v2778_v11  ;;  %v1885_v33 = vunpack.c.l.b16 %v1867_v26 }
 0x14e   : > { %v1886_v34 = vpack.c.b16 %v1885_v33, %v1590_v28 }
 0x14f   : > { %1938 = vmatpush.bf16.msrb.mxu0 %v2777_v15 }
 0x150   : > { %2782 = vmatpush.bf16.msrb.mxu1 %v2777_v15 }
 0x153   : > { %1939 = vmatpush.bf16.msrb.mxu0 %v2776_v21 }
 0x154   : > { %2783 = vmatpush.bf16.msrb.mxu1 %v2776_v21 }
 0x156   : > { %1558 = vmatmul.bf16.gmra.mxu0 %v1494_v36 }
 0x157   : > { %1940 = vmatpush.bf16.msrb.mxu0 %v2775_v35  ;;  %1656 = vmatmul.bf16.gmra.mxu1 %v1592_v23 }
 0x158   : > { %2784 = vmatpush.bf16.msrb.mxu1 %v2775_v35  ;;  %1748 = vmatmul.bf16.gmra.mxu2 %v1685_v51 }
 0x159   : > { %1853 = vmatmul.bf16.gmra.mxu3 %v1790_v39 }
 0x15b   : > { %1941 = vmatpush.bf16.msrb.mxu0 %v2774_v1 }
 0x15c   : > { %2785 = vmatpush.bf16.msrb.mxu1 %v2774_v1 }
 0x15f   : > { %1942 = vmatpush.bf16.msrb.mxu0 %v2773_v25 }
 0x160   : > { %2786 = vmatpush.bf16.msrb.mxu1 %v2773_v25 }
 0x163   : > { %1943 = vmatpush.bf16.msrb.mxu0 %v2772_v31 }
 0x164   : > { %2787 = vmatpush.bf16.msrb.mxu1 %v2772_v31 }
 0x166   : > { %1944 = vmatmul.bf16.vlgmr.msrb.gmra.mxu0 %v3404_v41  ;;  %v2832_v41 = vld [vmem:[%s3528_s4] ss:$0 sm:$0xff] }
 0x167   : > { %1949 = vmatmul.bf16.vlgmr.msrb.gmra.mxu1 %v1886_v34 }
 0x1a3   : > { %v1082_v43 = vpop.f32.mrf.mxu0 }
 0x1a4   : > { %v1234_v45 = vpop.f32.mrf.mxu1  ;;  %v1092_v63 = vadd.f32 %v2832_v41, %v1082_v43 }
 0x1a6   : > { %v1244_v2 = vadd.f32 %v1234_v45, %v1092_v63 }
 0x1ab   : > { %v1353_v24 = vpop.f32.mrf.mxu2  ;;  %v1084_v46 = vpop.f32.mrf.mxu0 }
 0x1ac   : > { %v1447_v37 = vpop.f32.mrf.mxu3  ;;  %v1236_v17 = vpop.f32.mrf.mxu1  ;;  %v1363_v4 = vadd.f32 %v1353_v24, %v1244_v2  ;;  %v1093_v10 = vadd.f32 %v2832_v41, %v1084_v46 }
 0x1ae   : > { %v1457_v13 = vadd.f32 %v1447_v37, %v1363_v4  ;;  %v1245_v14 = vadd.f32 %v1236_v17, %v1093_v10 }
 0x1b3   : > { %v1355_v47 = vpop.f32.mrf.mxu2  ;;  %v1087_v50 = vpop.f32.mrf.mxu0 }
 0x1b4   : > { %v1449_v49 = vpop.f32.mrf.mxu3  ;;  %v1239_v52 = vpop.f32.mrf.mxu1  ;;  %v1094_v0 = vadd.f32 %v2832_v41, %v1087_v50  ;;  %v1364_v16 = vadd.f32 %v1355_v47, %v1245_v14 }
 0x1b6   : > { %v1246_v3 = vadd.f32 %v1239_v52, %v1094_v0  ;;  %v1458_v28 = vadd.f32 %v1449_v49, %v1364_v16 }
 0x1bb   : > { %v1358_v53 = vpop.f32.mrf.mxu2  ;;  %v1089_v56 = vpop.f32.mrf.mxu0 }
 0x1bc   : > { %v1452_v54 = vpop.f32.mrf.mxu3  ;;  %v1241_v57 = vpop.f32.mrf.mxu1  ;;  %v1365_v5 = vadd.f32 %v1358_v53, %v1246_v3  ;;  %v1095_v11 = vadd.f32 %v2832_v41, %v1089_v56 }
 0x1be   : > { %v1459_v42 = vadd.f32 %v1452_v54, %v1365_v5  ;;  %v1247_v32 = vadd.f32 %v1241_v57, %v1095_v11 }
 0x1c3   : > { %v1360_v9 = vpop.f32.mrf.mxu2  ;;  %v1554_v59 = vpop.f32.mrf.mxu0 }
 0x1c4   : > { %v1454_v58 = vpop.f32.mrf.mxu3  ;;  %v1652_v60 = vpop.f32.mrf.mxu1  ;;  %v1564_v44 = vadd.f32 %v1554_v59, %v1457_v13  ;;  %v1366_v18 = vadd.f32 %v1360_v9, %v1247_v32 }
 0x1c6   : > { %v1662_v22 = vadd.f32 %v1652_v60, %v1564_v44  ;;  %v1460_v29 = vadd.f32 %v1454_v58, %v1366_v18 }
 0x1cb   : > { %v1744_v48 = vpop.f32.mrf.mxu2  ;;  %v1556_v61 = vpop.f32.mrf.mxu0 }
 0x1cc   : > { %v1849_v55 = vpop.f32.mrf.mxu3  ;;  %v1654_v62 = vpop.f32.mrf.mxu1  ;;  %v1754_v30 = vadd.f32 %v1744_v48, %v1662_v22  ;;  %v1565_v23 = vadd.f32 %v1556_v61, %v1458_v28 }
 0x1ce   : > { %v1859_v39 = vadd.f32 %v1849_v55, %v1754_v30  ;;  %v1663_v26 = vadd.f32 %v1654_v62, %v1565_v23 }
 0x1d3   : > { %v1746_v6 = vpop.f32.mrf.mxu2  ;;  %v1559_v7 = vpop.f32.mrf.mxu0 }
 0x1d4   : > { %v1657_v8 = vpop.f32.mrf.mxu1  ;;  %v1851_v12 = vpop.f32.mrf.mxu3  ;;  %v1566_v15 = vadd.f32 %v1559_v7, %v1459_v42  ;;  %v1755_v43 = vadd.f32 %v1746_v6, %v1663_v26 }
 0x1d6   : > { %v1664_v27 = vadd.f32 %v1657_v8, %v1566_v15  ;;  %v1860_v49 = vadd.f32 %v1851_v12, %v1755_v43 }
 0x1db   : > { %v1749_v19 = vpop.f32.mrf.mxu2  ;;  %v1561_v20 = vpop.f32.mrf.mxu0 }
 0x1dc   : > { %v1659_v21 = vpop.f32.mrf.mxu1  ;;  %v1756_v35 = vadd.f32 %v1749_v19, %v1664_v27  ;;  %v1854_v36 = vpop.f32.mrf.mxu3  ;;  %v1567_v51 = vadd.f32 %v1561_v20, %v1460_v29 }
 0x1de   : > { %v1861_v1 = vadd.f32 %v1854_v36, %v1756_v35  ;;  %v1665_v31 = vadd.f32 %v1659_v21, %v1567_v51 }
 0x1e3   : > { %v1751_v38 = vpop.f32.mrf.mxu2  ;;  %v1945_v40 = vpop.f32.mrf.mxu0 }
 0x1e4   : > { %v1950_v25 = vpop.f32.mrf.mxu1  ;;  %v1955_v33 = vadd.f32 %v1945_v40, %v1859_v39  ;;  %v1757_v45 = vadd.f32 %v1751_v38, %v1665_v31  ;;  %v1856_v47 = vpop.f32.mrf.mxu3 }
 0x1e5   : > { %v1957_v34 = vadd.f32 %v1950_v25, %v1861_v1 }
 0x1e6   : > { %v1959_v24 = vmul.f32 0.2, %v1955_v33  ;;  %v1862_v50 = vadd.f32 %v1856_v47, %v1757_v45 }
 0x1e7   : > { %v1961_v37 = vmul.f32 0.2, %v1957_v34 }
 0x1e8   : > { %v1963_v46 = vmax.f32 %v1955_v33, %v1959_v24 }
 0x1e9   : > { %v1965_v17 = vmax.f32 %v1957_v34, %v1961_v37 }
 0x1ea   : > { %1967 = vst [vmem:[%s2995_s19] sm:$0xff] %v1963_v46 }
 0x1eb   : > { %1969 = vst [vmem:[%s2995_s19 + $0x10] sm:$0xff] %v1965_v17  ;;  %v1947_v52 = vpop.f32.mrf.mxu0 }
 0x1ec   : > { %v1952_v53 = vpop.f32.mrf.mxu1  ;;  %v1956_v54 = vadd.f32 %v1947_v52, %v1860_v49 }
 0x1ed   : > { %v1958_v56 = vadd.f32 %v1952_v53, %v1862_v50 }
 0x1ee   : > { %v1960_v57 = vmul.f32 0.2, %v1956_v54 }
 0x1ef   : > { %v1962_v9 = vmul.f32 0.2, %v1958_v56 }
 0x1f0   : > { %v1964_v58 = vmax.f32 %v1956_v54, %v1960_v57 }
 0x1f1   : > { %v1966_v59 = vmax.f32 %v1958_v56, %v1962_v9 }
 0x1f2   : > { %1968 = vst [vmem:[%s2995_s19 + $0x8] sm:$0xff] %v1964_v58 }
 0x1f3   : > { %1970 = vst [vmem:[%s2995_s19 + $0x18] sm:$0xff] %v1966_v59 }
 0x1f4 PF: > { %s15_s22 = sadd.s32 1, %s2871_s22   ;;  %s3540_s18 = smov %s2863_s20 }
 0x1f5   : > { %p12_p10 = scmp.ge.s32.totalorder %s15_s22, 6   ;;  %s3541_s19 = smov %s2867_s21 }
 0x1f6   : > { %s3542_s20 = smov %s3545_s23  ;;  %s3543_s21 = smov %s3549_s24 }
 0x1f7   :  { %14 = sbr.rel (!%p12_p10) target bundleno = 3 (0x3), region = 90 }

</bundles_post_ra>
